<compile_context>
chip_gen: v7x
topology: tpu7x:2x2x1
jax: 0.10.0
libtpu: 0.0.40
codegen_flags: <defaults>
</compile_context>

<pallas_src>
import functools

import jax
import jax.numpy as jnp
from jax.experimental import pallas as pl
from jax.experimental.pallas import tpu as pltpu


LANE = 128        # lane width / channel + node padding granularity
MAX_TILE = 1024   # max row / contraction tile (nodes)


def _round_up(v, m):
    return (v + m - 1) // m * m


def _pick_tile(n_pad, cap, min_blocks=1):
    """Largest multiple of LANE that divides n_pad, <= cap, with >= min_blocks
    grid blocks when achievable (falls back to fewer blocks otherwise)."""
    m = n_pad // LANE
    best = 1
    for d in range(1, m + 1):
        if m % d == 0 and d * LANE <= cap and (m // d) >= min_blocks:
            best = max(best, d)
    return best * LANE


# ---------------------------------------------------------------------------
# Kernels
# ---------------------------------------------------------------------------

def proj_kernel(x_ref, wl_ref, wr_ref, b_ref, xl_ref, xrb_ref):
    """Per-row-block projections for one SAGE layer.

    xl  = x @ Wl           (bf16, feeds the big adj contraction)
    xrb = x @ Wr + b       (f32 root branch + conv bias, added in the epilogue)
    """
    x = x_ref[...]
    xl = jnp.dot(x, wl_ref[...], preferred_element_type=jnp.float32)
    xl_ref[...] = xl.astype(jnp.bfloat16)
    xrb_ref[...] = (jnp.dot(x, wr_ref[...], preferred_element_type=jnp.float32)
                    + b_ref[...])


def agg_kernel(adj_ref, xl_ref, xrb_ref, invdeg_ref, scale_ref, shift_ref,
               o_ref, acc_ref):
    """Hidden-layer tiled mean aggregation + SAGEConv epilogue + ReLU + BN.

    Grid: (rows i, contraction k). acc accumulates A[i,k] @ xl[k] over k;
    the exact mean scaling (1/deg) is applied in f32 in the epilogue.
    """
    k = pl.program_id(1)

    @pl.when(k == 0)
    def _():
        acc_ref[...] = jnp.zeros_like(acc_ref)

    acc_ref[...] += jnp.dot(adj_ref[...], xl_ref[...],
                            preferred_element_type=jnp.float32)

    @pl.when(k == pl.num_programs(1) - 1)
    def _():
        h = acc_ref[...] * invdeg_ref[...] + xrb_ref[...]
        h = jnp.maximum(h, 0.0)
        # F.dropout is identity in eval mode; BatchNorm1d folded to affine.
        o_ref[...] = (h * scale_ref[...] + shift_ref[...]).astype(o_ref.dtype)


def agg_head_kernel(adj_ref, xl_ref, xrb_ref, invdeg_ref, scale_ref, shift_ref,
                    wf_ref, bf_ref, o_ref, acc_ref):
    """Last-layer aggregation with BN + fused Linear(out->1) + sigmoid head.

    Emits a lane-dense [TM, 128] slab (column 0 is the real output)."""
    k = pl.program_id(1)

    @pl.when(k == 0)
    def _():
        acc_ref[...] = jnp.zeros_like(acc_ref)

    acc_ref[...] += jnp.dot(adj_ref[...], xl_ref[...],
                            preferred_element_type=jnp.float32)

    @pl.when(k == pl.num_programs(1) - 1)
    def _():
        h = acc_ref[...] * invdeg_ref[...] + xrb_ref[...]
        h = h * scale_ref[...] + shift_ref[...]          # BN (no ReLU on last layer)
        z = jnp.dot(h, wf_ref[...], preferred_element_type=jnp.float32) + bf_ref[...]
        o_ref[...] = jax.nn.sigmoid(z)


# ---------------------------------------------------------------------------
# pallas_call wrappers
# ---------------------------------------------------------------------------

def sage_proj(x, wl, wr, b, tm):
    n, cin = x.shape
    cout = wl.shape[1]
    return pl.pallas_call(
        proj_kernel,
        out_shape=(jax.ShapeDtypeStruct((n, cout), jnp.bfloat16),
                   jax.ShapeDtypeStruct((n, cout), jnp.float32)),
        grid_spec=pltpu.PrefetchScalarGridSpec(
            num_scalar_prefetch=0,
            grid=(n // tm,),
            in_specs=[pl.BlockSpec((tm, cin), lambda i: (i, 0)),
                      pl.BlockSpec((cin, cout), lambda i: (0, 0)),
                      pl.BlockSpec((cin, cout), lambda i: (0, 0)),
                      pl.BlockSpec((1, cout), lambda i: (0, 0))],
            out_specs=[pl.BlockSpec((tm, cout), lambda i: (i, 0)),
                       pl.BlockSpec((tm, cout), lambda i: (i, 0))],
        ),
        compiler_params=pltpu.CompilerParams(dimension_semantics=("parallel",)),
    )(x, wl, wr, b)


def sage_aggregate(adj_bf16, xl, xrb, invdeg, scale, shift, *, tm, tk):
    n = adj_bf16.shape[0]
    cout = xl.shape[1]
    return pl.pallas_call(
        agg_kernel,
        out_shape=jax.ShapeDtypeStruct((n, cout), jnp.bfloat16),
        grid_spec=pltpu.PrefetchScalarGridSpec(
            num_scalar_prefetch=0,
            grid=(n // tm, n // tk),
            in_specs=[pl.BlockSpec((tm, tk), lambda i, k: (i, k)),
                      pl.BlockSpec((tk, cout), lambda i, k: (k, 0)),
                      pl.BlockSpec((tm, cout), lambda i, k: (i, 0)),
                      pl.BlockSpec((tm, 1), lambda i, k: (i, 0)),
                      pl.BlockSpec((1, cout), lambda i, k: (0, 0)),
                      pl.BlockSpec((1, cout), lambda i, k: (0, 0))],
            out_specs=pl.BlockSpec((tm, cout), lambda i, k: (i, 0)),
            scratch_shapes=[pltpu.VMEM((tm, cout), jnp.float32)],
        ),
        compiler_params=pltpu.CompilerParams(
            dimension_semantics=("parallel", "arbitrary")),
    )(adj_bf16, xl, xrb, invdeg, scale, shift)


def sage_aggregate_head(adj_bf16, xl, xrb, invdeg, scale, shift, wf, bf,
                        *, tm, tk):
    n = adj_bf16.shape[0]
    cout = xl.shape[1]
    return pl.pallas_call(
        agg_head_kernel,
        out_shape=jax.ShapeDtypeStruct((n, LANE), jnp.float32),
        grid_spec=pltpu.PrefetchScalarGridSpec(
            num_scalar_prefetch=0,
            grid=(n // tm, n // tk),
            in_specs=[pl.BlockSpec((tm, tk), lambda i, k: (i, k)),
                      pl.BlockSpec((tk, cout), lambda i, k: (k, 0)),
                      pl.BlockSpec((tm, cout), lambda i, k: (i, 0)),
                      pl.BlockSpec((tm, 1), lambda i, k: (i, 0)),
                      pl.BlockSpec((1, cout), lambda i, k: (0, 0)),
                      pl.BlockSpec((1, cout), lambda i, k: (0, 0)),
                      pl.BlockSpec((cout, LANE), lambda i, k: (0, 0)),
                      pl.BlockSpec((1, LANE), lambda i, k: (0, 0))],
            out_specs=pl.BlockSpec((tm, LANE), lambda i, k: (i, 0)),
            scratch_shapes=[pltpu.VMEM((tm, cout), jnp.float32)],
        ),
        compiler_params=pltpu.CompilerParams(
            dimension_semantics=("parallel", "arbitrary")),
    )(adj_bf16, xl, xrb, invdeg, scale, shift, wf, bf)


# ---------------------------------------------------------------------------
# Parameters (logical shapes mirror SAGE.__init__), BN folding, lane padding
# ---------------------------------------------------------------------------

def init_params(key, in_channels, hidden_channels, out_channels, num_layers):
    dims = [in_channels] + [hidden_channels] * (num_layers - 1) + [out_channels]
    params = {"convs": [], "bns": [], "final": None}
    eps = 1e-5
    for layer in range(num_layers):
        c_in, c_out = dims[layer], dims[layer + 1]
        key, k1, k2 = jax.random.split(key, 3)
        wl = jax.random.normal(k1, (c_in, c_out), jnp.float32) / jnp.sqrt(jnp.float32(c_in))
        wr = jax.random.normal(k2, (c_in, c_out), jnp.float32) / jnp.sqrt(jnp.float32(c_in))
        b = jnp.zeros((1, c_out), jnp.float32)
        params["convs"].append((wl, wr, b))
        # BatchNorm1d defaults: gamma=1, beta=0, running_mean=0, running_var=1
        gamma = jnp.ones((1, c_out), jnp.float32)
        beta = jnp.zeros((1, c_out), jnp.float32)
        running_mean = jnp.zeros((1, c_out), jnp.float32)
        running_var = jnp.ones((1, c_out), jnp.float32)
        scale = gamma / jnp.sqrt(running_var + eps)
        shift = beta - running_mean * scale
        params["bns"].append((scale, shift))
    key, kf = jax.random.split(key)
    w_final = jax.random.normal(kf, (out_channels, 1), jnp.float32) / jnp.sqrt(
        jnp.float32(out_channels))
    b_final = jnp.zeros((1, 1), jnp.float32)
    params["final"] = (w_final, b_final)
    return params


def prepare_params(params):
    """Zero-pad channel dims to multiples of 128 and cast matmul weights to bf16.

    Exactness notes: padded weight rows/cols are zero; padded BN channels use
    scale=shift=0 so padded features stay exactly 0 going into the next layer.
    """
    convs_p, bns_p = [], []
    for (wl, wr, b), (scale, shift) in zip(params["convs"], params["bns"]):
        cin, cout = wl.shape
        cin_p, cout_p = _round_up(cin, LANE), _round_up(cout, LANE)
        wl_p = (jnp.zeros((cin_p, cout_p), jnp.float32)
                .at[:cin, :cout].set(wl).astype(jnp.bfloat16))
        wr_p = (jnp.zeros((cin_p, cout_p), jnp.float32)
                .at[:cin, :cout].set(wr).astype(jnp.bfloat16))
        b_p = jnp.zeros((1, cout_p), jnp.float32).at[:, :cout].set(b)
        scale_p = jnp.zeros((1, cout_p), jnp.float32).at[:, :cout].set(scale)
        shift_p = jnp.zeros((1, cout_p), jnp.float32).at[:, :cout].set(shift)
        convs_p.append((wl_p, wr_p, b_p))
        bns_p.append((scale_p, shift_p))
    w_f, b_f = params["final"]
    c = w_f.shape[0]
    c_p = _round_up(c, LANE)
    w_f_p = jnp.zeros((c_p, LANE), jnp.float32).at[:c, :1].set(w_f)
    b_f_p = jnp.zeros((1, LANE), jnp.float32).at[:, :1].set(b_f)
    return {"convs": convs_p, "bns": bns_p, "final": (w_f_p, b_f_p)}


def prepare_inputs(x, adj_bin):
    """One-off (outside the jitted forward): pad nodes/channels, cast adjacency
    to exact {0,1} bf16, and build the f32 per-row 1/deg vector.

    Padded adjacency rows/cols are zero; padded node rows acquire only
    bias/shift values downstream and are sliced off at the end (never feed back
    into real rows because their adjacency columns are zero)."""
    n, cin = x.shape
    n_pad = _round_up(n, LANE)
    cin_p = _round_up(cin, LANE)
    adj_p = (jnp.zeros((n_pad, n_pad), jnp.float32)
             .at[:n, :n].set(adj_bin).astype(jnp.bfloat16))   # {0,1} exact in bf16
    deg = jnp.maximum(adj_bin.sum(axis=1), 1.0)
    invdeg_p = jnp.ones((n_pad, 1), jnp.float32).at[:n, 0].set(1.0 / deg)
    x_p = (jnp.zeros((n_pad, cin_p), jnp.float32)
           .at[:n, :cin].set(x).astype(jnp.bfloat16))
    return x_p, adj_p, invdeg_p


# ---------------------------------------------------------------------------
# Full forward
# ---------------------------------------------------------------------------

def sage_forward(padded_params, x_p, adj_p, invdeg_p):
    n_pad = adj_p.shape[0]
    # Prefer >= 2 row blocks so the "parallel" axis can shard across v7x's 2 TCs.
    tm = _pick_tile(n_pad, MAX_TILE, min_blocks=2 if n_pad >= 2 * LANE else 1)
    tk = _pick_tile(n_pad, MAX_TILE, min_blocks=1)

    h = x_p
    num_layers = len(padded_params["convs"])
    for layer in range(num_layers):
        wl, wr, b = padded_params["convs"][layer]
        scale, shift = padded_params["bns"][layer]
        xl, xrb = sage_proj(h, wl, wr, b, tm)
        if layer < num_layers - 1:
            h = sage_aggregate(adj_p, xl, xrb, invdeg_p, scale, shift,
                               tm=tm, tk=tk)
        else:
            wf, bf = padded_params["final"]
            y_pad = sage_aggregate_head(adj_p, xl, xrb, invdeg_p, scale, shift,
                                        wf, bf, tm=tm, tk=tk)
    return y_pad                    # [n_pad, 128] lane-dense slab; col 0 is real


def reference_forward(params, x, adj_norm):
    """Pure-JAX f32 reference (same eval-mode semantics)."""
    h = x
    num_layers = len(params["convs"])
    for layer in range(num_layers):
        wl, wr, b = params["convs"][layer]
        scale, shift = params["bns"][layer]
        hc = adj_norm @ h @ wl + h @ wr + b
        if layer < num_layers - 1:
            hc = jnp.maximum(hc, 0.0)
        h = hc * scale + shift
    w_f, b_f = params["final"]
    return jax.nn.sigmoid(h @ w_f + b_f)


# ---------------------------------------------------------------------------
# Main
# ---------------------------------------------------------------------------

if __name__ == "__main__":
    # small shapes consistent with the module
    N = 16
    IN_CHANNELS = 8
    HIDDEN_CHANNELS = 32
    OUT_CHANNELS = 16
    NUM_LAYERS = 3
    # dropout = 0.5 in __init__, but eval-mode forward -> identity
    # TODO(synk): return_inter / optimizer / reset_parameters are training-side
    # features with no forward-pass kernel equivalent; not implemented.

    key = jax.random.PRNGKey(0)
    key, kx, kadj = jax.random.split(key, 3)

    x = jax.random.normal(kx, (N, IN_CHANNELS), jnp.float32)

    # random dense binary adjacency; mean aggregation = A @ x scaled by 1/deg
    adj = (jax.random.uniform(kadj, (N, N)) < 0.3).astype(jnp.float32)
    deg = jnp.maximum(adj.sum(axis=1, keepdims=True), 1.0)
    adj_norm = adj / deg                      # f32 reference form

    params = init_params(key, IN_CHANNELS, HIDDEN_CHANNELS, OUT_CHANNELS, NUM_LAYERS)
    padded = prepare_params(params)

    # one-off prep (hoisted out of the jitted forward: no per-call pad/cast)
    x_p, adj_p, invdeg_p = prepare_inputs(x, adj)

    fwd = jax.jit(sage_forward)
    y_pad = jax.block_until_ready(fwd(padded, x_p, adj_p, invdeg_p))
    out = y_pad[:N, :1]

    assert out.shape == (N, 1), out.shape
    assert bool(jnp.all(jnp.isfinite(out)))
    assert bool(jnp.all((out >= 0.0) & (out <= 1.0)))  # sigmoid range

    ref = reference_forward(params, x, adj_norm)
    # tolerance covers the bf16 activation/weight path (f32 accumulation, exact
    # binary adjacency + f32 1/deg); much tighter than the previous 0.1
    err = float(jnp.max(jnp.abs(out - ref)))
    assert err < 3e-2, err

    print("KERNEL_OK")
</pallas_src>

<mosaic_0001>
module attributes {stable_mosaic.version = 11 : i64} {
  func.func @agg_kernel(%arg0: i32, %arg1: i32, %arg2: memref<128x128xbf16, #tpu.memory_space<vmem>>, %arg3: memref<128x128xbf16, #tpu.memory_space<vmem>>, %arg4: memref<128x128xf32, #tpu.memory_space<vmem>>, %arg5: memref<128x1xf32, #tpu.memory_space<vmem>>, %arg6: memref<1x128xf32, #tpu.memory_space<vmem>>, %arg7: memref<1x128xf32, #tpu.memory_space<vmem>>, %arg8: memref<128x128xbf16, #tpu.memory_space<vmem>>, %arg9: memref<128x128xf32, #tpu.memory_space<vmem>>) attributes {dimension_semantics = [#tpu.dimension_semantics<parallel>, #tpu.dimension_semantics<arbitrary>], iteration_bounds = array<i64: 1, 1>, scalar_prefetch = 0 : i64, scratch_operands = 1 : i64, tpu.core_type = #tpu.core_type<tc>, window_params = [{transform_indices = @transform_0, window_bounds = array<i64: 128, 128>}, {transform_indices = @transform_1, window_bounds = array<i64: 128, 128>}, {transform_indices = @transform_2, window_bounds = array<i64: 128, 128>}, {transform_indices = @transform_3, window_bounds = array<i64: 128, 1>}, {pipeline_mode = #tpu.pipeline_mode<synchronous>, transform_indices = @transform_4, window_bounds = array<i64: 1, 128>}, {pipeline_mode = #tpu.pipeline_mode<synchronous>, transform_indices = @transform_5, window_bounds = array<i64: 1, 128>}, {transform_indices = @transform_6, window_bounds = array<i64: 128, 128>}]} {
    %c0_i32 = arith.constant 0 : i32
    %0 = arith.cmpi eq, %arg1, %c0_i32 : i32
    %1 = arith.extui %0 : i1 to i32
    %c0_i32_0 = arith.constant 0 : i32
    %2 = arith.cmpi ne, %1, %c0_i32_0 : i32
    scf.if %2 {
      %cst_10 = arith.constant 0.000000e+00 : f32
      %12 = vector.broadcast %cst_10 : f32 to vector<128x128xf32>
      %c0_11 = arith.constant 0 : index
      %c0_12 = arith.constant 0 : index
      %13 = vector.load %arg9[%c0_11, %c0_12] : memref<128x128xf32, #tpu.memory_space<vmem>>, vector<128x128xf32>
      tpu.vector_store %arg9[%c0_11, %c0_12], %12 {strides = array<i32>} : memref<128x128xf32, #tpu.memory_space<vmem>>, vector<128x128xf32>,
    } else {
    }
    %c0 = arith.constant 0 : index
    %c0_1 = arith.constant 0 : index
    %3 = vector.load %arg9[%c0, %c0_1] : memref<128x128xf32, #tpu.memory_space<vmem>>, vector<128x128xf32>
    %c0_2 = arith.constant 0 : index
    %c0_3 = arith.constant 0 : index
    %4 = vector.load %arg2[%c0_2, %c0_3] : memref<128x128xbf16, #tpu.memory_space<vmem>>, vector<128x128xbf16>
    %c0_4 = arith.constant 0 : index
    %c0_5 = arith.constant 0 : index
    %5 = vector.load %arg3[%c0_4, %c0_5] : memref<128x128xbf16, #tpu.memory_space<vmem>>, vector<128x128xbf16>
    %cst = arith.constant dense<0.000000e+00> : vector<128x128xf32>
    %6 = tpu.matmul %4, %5, %cst {dimension_numbers = #tpu.dot_dimension_numbers<[1], [0], [0], [1], [0, 0, 1, 1], [], []>} : vector<128x128xbf16>, vector<128x128xbf16>, vector<128x128xf32> -> vector<128x128xf32>
    %7 = arith.addf %3, %6 : vector<128x128xf32>
    %c0_6 = arith.constant 0 : index
    %c0_7 = arith.constant 0 : index
    %8 = vector.load %arg9[%c0_6, %c0_7] : memref<128x128xf32, #tpu.memory_space<vmem>>, vector<128x128xf32>
    tpu.vector_store %arg9[%c0_6, %c0_7], %7 {strides = array<i32>} : memref<128x128xf32, #tpu.memory_space<vmem>>, vector<128x128xf32>,
    %c0_i32_8 = arith.constant 0 : i32
    %9 = arith.cmpi eq, %arg1, %c0_i32_8 : i32
    %10 = arith.extui %9 : i1 to i32
    %c0_i32_9 = arith.constant 0 : i32
    %11 = arith.cmpi ne, %10, %c0_i32_9 : i32
    scf.if %11 {
      %c0_10 = arith.constant 0 : index
      %c0_11 = arith.constant 0 : index
      %12 = vector.load %arg9[%c0_10, %c0_11] : memref<128x128xf32, #tpu.memory_space<vmem>>, vector<128x128xf32>
      %c0_12 = arith.constant 0 : index
      %c0_13 = arith.constant 0 : index
      %13 = vector.load %arg5[%c0_12, %c0_13] : memref<128x1xf32, #tpu.memory_space<vmem>>, vector<128x1xf32>
      %14 = vector.broadcast %13 : vector<128x1xf32> to vector<128x128xf32>
      %15 = arith.mulf %12, %14 : vector<128x128xf32>
      %c0_14 = arith.constant 0 : index
      %c0_15 = arith.constant 0 : index
      %16 = vector.load %arg4[%c0_14, %c0_15] : memref<128x128xf32, #tpu.memory_space<vmem>>, vector<128x128xf32>
      %17 = arith.addf %15, %16 : vector<128x128xf32>
      %cst_16 = arith.constant 0.000000e+00 : f32
      %18 = vector.broadcast %cst_16 : f32 to vector<128x128xf32>
      %19 = arith.maximumf %17, %18 : vector<128x128xf32>
      %c0_17 = arith.constant 0 : index
      %c0_18 = arith.constant 0 : index
      %20 = vector.load %arg6[%c0_17, %c0_18] : memref<1x128xf32, #tpu.memory_space<vmem>>, vector<1x128xf32>
      %21 = vector.broadcast %20 : vector<1x128xf32> to vector<128x128xf32>
      %22 = arith.mulf %19, %21 : vector<128x128xf32>
      %c0_19 = arith.constant 0 : index
      %c0_20 = arith.constant 0 : index
      %23 = vector.load %arg7[%c0_19, %c0_20] : memref<1x128xf32, #tpu.memory_space<vmem>>, vector<1x128xf32>
      %24 = vector.broadcast %23 : vector<1x128xf32> to vector<128x128xf32>
      %25 = arith.addf %22, %24 : vector<128x128xf32>
      %26 = arith.truncf %25 : vector<128x128xf32> to vector<128x128xbf16>
      %c0_21 = arith.constant 0 : index
      %c0_22 = arith.constant 0 : index
      %27 = vector.load %arg8[%c0_21, %c0_22] : memref<128x128xbf16, #tpu.memory_space<vmem>>, vector<128x128xbf16>
      tpu.vector_store %arg8[%c0_21, %c0_22], %26 {strides = array<i32>} : memref<128x128xbf16, #tpu.memory_space<vmem>>, vector<128x128xbf16>,
    } else {
    }
    return
  }
  func.func @transform_0(%arg0: i32, %arg1: i32) -> (i32, i32) {
    %c0_i32 = arith.constant 0 : i32
    return %arg0, %arg1 : i32, i32
  }
  func.func @transform_1(%arg0: i32, %arg1: i32) -> (i32, i32) {
    %c0_i32 = arith.constant 0 : i32
    %c0_i32_0 = arith.constant 0 : i32
    return %arg1, %c0_i32 : i32, i32
  }
  func.func @transform_2(%arg0: i32, %arg1: i32) -> (i32, i32) {
    %c0_i32 = arith.constant 0 : i32
    %c0_i32_0 = arith.constant 0 : i32
    return %arg0, %c0_i32 : i32, i32
  }
  func.func @transform_3(%arg0: i32, %arg1: i32) -> (i32, i32) {
    %c0_i32 = arith.constant 0 : i32
    %c0_i32_0 = arith.constant 0 : i32
    return %arg0, %c0_i32 : i32, i32
  }
  func.func @transform_4(%arg0: i32, %arg1: i32) -> (i32, i32) {
    %c0_i32 = arith.constant 0 : i32
    %c0_i32_0 = arith.constant 0 : i32
    %c0_i32_1 = arith.constant 0 : i32
    return %c0_i32, %c0_i32_0 : i32, i32
  }
  func.func @transform_5(%arg0: i32, %arg1: i32) -> (i32, i32) {
    %c0_i32 = arith.constant 0 : i32
    %c0_i32_0 = arith.constant 0 : i32
    %c0_i32_1 = arith.constant 0 : i32
    return %c0_i32, %c0_i32_0 : i32, i32
  }
  func.func @transform_6(%arg0: i32, %arg1: i32) -> (i32, i32) {
    %c0_i32 = arith.constant 0 : i32
    %c0_i32_0 = arith.constant 0 : i32
    return %arg0, %c0_i32 : i32, i32
  }
}

module attributes {stable_mosaic.version = 11 : i64} {
  func.func @proj_kernel(%arg0: i32, %arg1: memref<128x128xbf16, #tpu.memory_space<vmem>>, %arg2: memref<128x128xbf16, #tpu.memory_space<vmem>>, %arg3: memref<128x128xbf16, #tpu.memory_space<vmem>>, %arg4: memref<1x128xf32, #tpu.memory_space<vmem>>, %arg5: memref<128x128xbf16, #tpu.memory_space<vmem>>, %arg6: memref<128x128xf32, #tpu.memory_space<vmem>>) attributes {dimension_semantics = [#tpu.dimension_semantics<parallel>], iteration_bounds = array<i64: 1>, scalar_prefetch = 0 : i64, scratch_operands = 0 : i64, tpu.core_type = #tpu.core_type<tc>, window_params = [{transform_indices = @transform_0, window_bounds = array<i64: 128, 128>}, {pipeline_mode = #tpu.pipeline_mode<synchronous>, transform_indices = @transform_1, window_bounds = array<i64: 128, 128>}, {pipeline_mode = #tpu.pipeline_mode<synchronous>, transform_indices = @transform_2, window_bounds = array<i64: 128, 128>}, {pipeline_mode = #tpu.pipeline_mode<synchronous>, transform_indices = @transform_3, window_bounds = array<i64: 1, 128>}, {transform_indices = @transform_4, window_bounds = array<i64: 128, 128>}, {transform_indices = @transform_5, window_bounds = array<i64: 128, 128>}]} {
    %c0 = arith.constant 0 : index
    %c0_0 = arith.constant 0 : index
    %0 = vector.load %arg1[%c0, %c0_0] : memref<128x128xbf16, #tpu.memory_space<vmem>>, vector<128x128xbf16>
    %c0_1 = arith.constant 0 : index
    %c0_2 = arith.constant 0 : index
    %1 = vector.load %arg2[%c0_1, %c0_2] : memref<128x128xbf16, #tpu.memory_space<vmem>>, vector<128x128xbf16>
    %cst = arith.constant dense<0.000000e+00> : vector<128x128xf32>
    %2 = tpu.matmul %0, %1, %cst {dimension_numbers = #tpu.dot_dimension_numbers<[1], [0], [0], [1], [0, 0, 1, 1], [], []>} : vector<128x128xbf16>, vector<128x128xbf16>, vector<128x128xf32> -> vector<128x128xf32>
    %3 = arith.truncf %2 : vector<128x128xf32> to vector<128x128xbf16>
    %c0_3 = arith.constant 0 : index
    %c0_4 = arith.constant 0 : index
    %4 = vector.load %arg5[%c0_3, %c0_4] : memref<128x128xbf16, #tpu.memory_space<vmem>>, vector<128x128xbf16>
    tpu.vector_store %arg5[%c0_3, %c0_4], %3 {strides = array<i32>} : memref<128x128xbf16, #tpu.memory_space<vmem>>, vector<128x128xbf16>,
    %c0_5 = arith.constant 0 : index
    %c0_6 = arith.constant 0 : index
    %5 = vector.load %arg3[%c0_5, %c0_6] : memref<128x128xbf16, #tpu.memory_space<vmem>>, vector<128x128xbf16>
    %cst_7 = arith.constant dense<0.000000e+00> : vector<128x128xf32>
    %6 = tpu.matmul %0, %5, %cst_7 {dimension_numbers = #tpu.dot_dimension_numbers<[1], [0], [0], [1], [0, 0, 1, 1], [], []>} : vector<128x128xbf16>, vector<128x128xbf16>, vector<128x128xf32> -> vector<128x128xf32>
    %c0_8 = arith.constant 0 : index
    %c0_9 = arith.constant 0 : index
    %7 = vector.load %arg4[%c0_8, %c0_9] : memref<1x128xf32, #tpu.memory_space<vmem>>, vector<1x128xf32>
    %8 = vector.broadcast %7 : vector<1x128xf32> to vector<128x128xf32>
    %9 = arith.addf %6, %8 : vector<128x128xf32>
    %c0_10 = arith.constant 0 : index
    %c0_11 = arith.constant 0 : index
    %10 = vector.load %arg6[%c0_10, %c0_11] : memref<128x128xf32, #tpu.memory_space<vmem>>, vector<128x128xf32>
    tpu.vector_store %arg6[%c0_10, %c0_11], %9 {strides = array<i32>} : memref<128x128xf32, #tpu.memory_space<vmem>>, vector<128x128xf32>,
    return
  }
  func.func @transform_0(%arg0: i32) -> (i32, i32) {
    %c0_i32 = arith.constant 0 : i32
    %c0_i32_0 = arith.constant 0 : i32
    return %arg0, %c0_i32 : i32, i32
  }
  func.func @transform_1(%arg0: i32) -> (i32, i32) {
    %c0_i32 = arith.constant 0 : i32
    %c0_i32_0 = arith.constant 0 : i32
    %c0_i32_1 = arith.constant 0 : i32
    return %c0_i32, %c0_i32_0 : i32, i32
  }
  func.func @transform_2(%arg0: i32) -> (i32, i32) {
    %c0_i32 = arith.constant 0 : i32
    %c0_i32_0 = arith.constant 0 : i32
    %c0_i32_1 = arith.constant 0 : i32
    return %c0_i32, %c0_i32_0 : i32, i32
  }
  func.func @transform_3(%arg0: i32) -> (i32, i32) {
    %c0_i32 = arith.constant 0 : i32
    %c0_i32_0 = arith.constant 0 : i32
    %c0_i32_1 = arith.constant 0 : i32
    return %c0_i32, %c0_i32_0 : i32, i32
  }
  func.func @transform_4(%arg0: i32) -> (i32, i32) {
    %c0_i32 = arith.constant 0 : i32
    %c0_i32_0 = arith.constant 0 : i32
    return %arg0, %c0_i32 : i32, i32
  }
  func.func @transform_5(%arg0: i32) -> (i32, i32) {
    %c0_i32 = arith.constant 0 : i32
    %c0_i32_0 = arith.constant 0 : i32
    return %arg0, %c0_i32 : i32, i32
  }
}

module attributes {stable_mosaic.version = 11 : i64} {
  func.func @proj_kernel(%arg0: i32, %arg1: memref<128x128xbf16, #tpu.memory_space<vmem>>, %arg2: memref<128x128xbf16, #tpu.memory_space<vmem>>, %arg3: memref<128x128xbf16, #tpu.memory_space<vmem>>, %arg4: memref<1x128xf32, #tpu.memory_space<vmem>>, %arg5: memref<128x128xbf16, #tpu.memory_space<vmem>>, %arg6: memref<128x128xf32, #tpu.memory_space<vmem>>) attributes {dimension_semantics = [#tpu.dimension_semantics<parallel>], iteration_bounds = array<i64: 1>, scalar_prefetch = 0 : i64, scratch_operands = 0 : i64, tpu.core_type = #tpu.core_type<tc>, window_params = [{transform_indices = @transform_0, window_bounds = array<i64: 128, 128>}, {pipeline_mode = #tpu.pipeline_mode<synchronous>, transform_indices = @transform_1, window_bounds = array<i64: 128, 128>}, {pipeline_mode = #tpu.pipeline_mode<synchronous>, transform_indices = @transform_2, window_bounds = array<i64: 128, 128>}, {pipeline_mode = #tpu.pipeline_mode<synchronous>, transform_indices = @transform_3, window_bounds = array<i64: 1, 128>}, {transform_indices = @transform_4, window_bounds = array<i64: 128, 128>}, {transform_indices = @transform_5, window_bounds = array<i64: 128, 128>}]} {
    %c0 = arith.constant 0 : index
    %c0_0 = arith.constant 0 : index
    %0 = vector.load %arg1[%c0, %c0_0] : memref<128x128xbf16, #tpu.memory_space<vmem>>, vector<128x128xbf16>
    %c0_1 = arith.constant 0 : index
    %c0_2 = arith.constant 0 : index
    %1 = vector.load %arg2[%c0_1, %c0_2] : memref<128x128xbf16, #tpu.memory_space<vmem>>, vector<128x128xbf16>
    %cst = arith.constant dense<0.000000e+00> : vector<128x128xf32>
    %2 = tpu.matmul %0, %1, %cst {dimension_numbers = #tpu.dot_dimension_numbers<[1], [0], [0], [1], [0, 0, 1, 1], [], []>} : vector<128x128xbf16>, vector<128x128xbf16>, vector<128x128xf32> -> vector<128x128xf32>
    %3 = arith.truncf %2 : vector<128x128xf32> to vector<128x128xbf16>
    %c0_3 = arith.constant 0 : index
    %c0_4 = arith.constant 0 : index
    %4 = vector.load %arg5[%c0_3, %c0_4] : memref<128x128xbf16, #tpu.memory_space<vmem>>, vector<128x128xbf16>
    tpu.vector_store %arg5[%c0_3, %c0_4], %3 {strides = array<i32>} : memref<128x128xbf16, #tpu.memory_space<vmem>>, vector<128x128xbf16>,
    %c0_5 = arith.constant 0 : index
    %c0_6 = arith.constant 0 : index
    %5 = vector.load %arg3[%c0_5, %c0_6] : memref<128x128xbf16, #tpu.memory_space<vmem>>, vector<128x128xbf16>
    %cst_7 = arith.constant dense<0.000000e+00> : vector<128x128xf32>
    %6 = tpu.matmul %0, %5, %cst_7 {dimension_numbers = #tpu.dot_dimension_numbers<[1], [0], [0], [1], [0, 0, 1, 1], [], []>} : vector<128x128xbf16>, vector<128x128xbf16>, vector<128x128xf32> -> vector<128x128xf32>
    %c0_8 = arith.constant 0 : index
    %c0_9 = arith.constant 0 : index
    %7 = vector.load %arg4[%c0_8, %c0_9] : memref<1x128xf32, #tpu.memory_space<vmem>>, vector<1x128xf32>
    %8 = vector.broadcast %7 : vector<1x128xf32> to vector<128x128xf32>
    %9 = arith.addf %6, %8 : vector<128x128xf32>
    %c0_10 = arith.constant 0 : index
    %c0_11 = arith.constant 0 : index
    %10 = vector.load %arg6[%c0_10, %c0_11] : memref<128x128xf32, #tpu.memory_space<vmem>>, vector<128x128xf32>
    tpu.vector_store %arg6[%c0_10, %c0_11], %9 {strides = array<i32>} : memref<128x128xf32, #tpu.memory_space<vmem>>, vector<128x128xf32>,
    return
  }
  func.func @transform_0(%arg0: i32) -> (i32, i32) {
    %c0_i32 = arith.constant 0 : i32
    %c0_i32_0 = arith.constant 0 : i32
    return %arg0, %c0_i32 : i32, i32
  }
  func.func @transform_1(%arg0: i32) -> (i32, i32) {
    %c0_i32 = arith.constant 0 : i32
    %c0_i32_0 = arith.constant 0 : i32
    %c0_i32_1 = arith.constant 0 : i32
    return %c0_i32, %c0_i32_0 : i32, i32
  }
  func.func @transform_2(%arg0: i32) -> (i32, i32) {
    %c0_i32 = arith.constant 0 : i32
    %c0_i32_0 = arith.constant 0 : i32
    %c0_i32_1 = arith.constant 0 : i32
    return %c0_i32, %c0_i32_0 : i32, i32
  }
  func.func @transform_3(%arg0: i32) -> (i32, i32) {
    %c0_i32 = arith.constant 0 : i32
    %c0_i32_0 = arith.constant 0 : i32
    %c0_i32_1 = arith.constant 0 : i32
    return %c0_i32, %c0_i32_0 : i32, i32
  }
  func.func @transform_4(%arg0: i32) -> (i32, i32) {
    %c0_i32 = arith.constant 0 : i32
    %c0_i32_0 = arith.constant 0 : i32
    return %arg0, %c0_i32 : i32, i32
  }
  func.func @transform_5(%arg0: i32) -> (i32, i32) {
    %c0_i32 = arith.constant 0 : i32
    %c0_i32_0 = arith.constant 0 : i32
    return %arg0, %c0_i32 : i32, i32
  }
}

module attributes {stable_mosaic.version = 11 : i64} {
  func.func @agg_head_kernel(%arg0: i32, %arg1: i32, %arg2: memref<128x128xbf16, #tpu.memory_space<vmem>>, %arg3: memref<128x128xbf16, #tpu.memory_space<vmem>>, %arg4: memref<128x128xf32, #tpu.memory_space<vmem>>, %arg5: memref<128x1xf32, #tpu.memory_space<vmem>>, %arg6: memref<1x128xf32, #tpu.memory_space<vmem>>, %arg7: memref<1x128xf32, #tpu.memory_space<vmem>>, %arg8: memref<128x128xf32, #tpu.memory_space<vmem>>, %arg9: memref<1x128xf32, #tpu.memory_space<vmem>>, %arg10: memref<128x128xf32, #tpu.memory_space<vmem>>, %arg11: memref<128x128xf32, #tpu.memory_space<vmem>>) attributes {dimension_semantics = [#tpu.dimension_semantics<parallel>, #tpu.dimension_semantics<arbitrary>], iteration_bounds = array<i64: 1, 1>, scalar_prefetch = 0 : i64, scratch_operands = 1 : i64, tpu.core_type = #tpu.core_type<tc>, window_params = [{transform_indices = @transform_0, window_bounds = array<i64: 128, 128>}, {transform_indices = @transform_1, window_bounds = array<i64: 128, 128>}, {transform_indices = @transform_2, window_bounds = array<i64: 128, 128>}, {transform_indices = @transform_3, window_bounds = array<i64: 128, 1>}, {pipeline_mode = #tpu.pipeline_mode<synchronous>, transform_indices = @transform_4, window_bounds = array<i64: 1, 128>}, {pipeline_mode = #tpu.pipeline_mode<synchronous>, transform_indices = @transform_5, window_bounds = array<i64: 1, 128>}, {pipeline_mode = #tpu.pipeline_mode<synchronous>, transform_indices = @transform_6, window_bounds = array<i64: 128, 128>}, {pipeline_mode = #tpu.pipeline_mode<synchronous>, transform_indices = @transform_7, window_bounds = array<i64: 1, 128>}, {transform_indices = @transform_8, window_bounds = array<i64: 128, 128>}]} {
    %c0_i32 = arith.constant 0 : i32
    %0 = arith.cmpi eq, %arg1, %c0_i32 : i32
    %1 = arith.extui %0 : i1 to i32
    %c0_i32_0 = arith.constant 0 : i32
    %2 = arith.cmpi ne, %1, %c0_i32_0 : i32
    scf.if %2 {
      %cst_10 = arith.constant 0.000000e+00 : f32
      %12 = vector.broadcast %cst_10 : f32 to vector<128x128xf32>
      %c0_11 = arith.constant 0 : index
      %c0_12 = arith.constant 0 : index
      %13 = vector.load %arg11[%c0_11, %c0_12] : memref<128x128xf32, #tpu.memory_space<vmem>>, vector<128x128xf32>
      tpu.vector_store %arg11[%c0_11, %c0_12], %12 {strides = array<i32>} : memref<128x128xf32, #tpu.memory_space<vmem>>, vector<128x128xf32>,
    } else {
    }
    %c0 = arith.constant 0 : index
    %c0_1 = arith.constant 0 : index
    %3 = vector.load %arg11[%c0, %c0_1] : memref<128x128xf32, #tpu.memory_space<vmem>>, vector<128x128xf32>
    %c0_2 = arith.constant 0 : index
    %c0_3 = arith.constant 0 : index
    %4 = vector.load %arg2[%c0_2, %c0_3] : memref<128x128xbf16, #tpu.memory_space<vmem>>, vector<128x128xbf16>
    %c0_4 = arith.constant 0 : index
    %c0_5 = arith.constant 0 : index
    %5 = vector.load %arg3[%c0_4, %c0_5] : memref<128x128xbf16, #tpu.memory_space<vmem>>, vector<128x128xbf16>
    %cst = arith.constant dense<0.000000e+00> : vector<128x128xf32>
    %6 = tpu.matmul %4, %5, %cst {dimension_numbers = #tpu.dot_dimension_numbers<[1], [0], [0], [1], [0, 0, 1, 1], [], []>} : vector<128x128xbf16>, vector<128x128xbf16>, vector<128x128xf32> -> vector<128x128xf32>
    %7 = arith.addf %3, %6 : vector<128x128xf32>
    %c0_6 = arith.constant 0 : index
    %c0_7 = arith.constant 0 : index
    %8 = vector.load %arg11[%c0_6, %c0_7] : memref<128x128xf32, #tpu.memory_space<vmem>>, vector<128x128xf32>
    tpu.vector_store %arg11[%c0_6, %c0_7], %7 {strides = array<i32>} : memref<128x128xf32, #tpu.memory_space<vmem>>, vector<128x128xf32>,
    %c0_i32_8 = arith.constant 0 : i32
    %9 = arith.cmpi eq, %arg1, %c0_i32_8 : i32
    %10 = arith.extui %9 : i1 to i32
    %c0_i32_9 = arith.constant 0 : i32
    %11 = arith.cmpi ne, %10, %c0_i32_9 : i32
    scf.if %11 {
      %c0_10 = arith.constant 0 : index
      %c0_11 = arith.constant 0 : index
      %12 = vector.load %arg11[%c0_10, %c0_11] : memref<128x128xf32, #tpu.memory_space<vmem>>, vector<128x128xf32>
      %c0_12 = arith.constant 0 : index
      %c0_13 = arith.constant 0 : index
      %13 = vector.load %arg5[%c0_12, %c0_13] : memref<128x1xf32, #tpu.memory_space<vmem>>, vector<128x1xf32>
      %14 = vector.broadcast %13 : vector<128x1xf32> to vector<128x128xf32>
      %15 = arith.mulf %12, %14 : vector<128x128xf32>
      %c0_14 = arith.constant 0 : index
      %c0_15 = arith.constant 0 : index
      %16 = vector.load %arg4[%c0_14, %c0_15] : memref<128x128xf32, #tpu.memory_space<vmem>>, vector<128x128xf32>
      %17 = arith.addf %15, %16 : vector<128x128xf32>
      %c0_16 = arith.constant 0 : index
      %c0_17 = arith.constant 0 : index
      %18 = vector.load %arg6[%c0_16, %c0_17] : memref<1x128xf32, #tpu.memory_space<vmem>>, vector<1x128xf32>
      %19 = vector.broadcast %18 : vector<1x128xf32> to vector<128x128xf32>
      %20 = arith.mulf %17, %19 : vector<128x128xf32>
      %c0_18 = arith.constant 0 : index
      %c0_19 = arith.constant 0 : index
      %21 = vector.load %arg7[%c0_18, %c0_19] : memref<1x128xf32, #tpu.memory_space<vmem>>, vector<1x128xf32>
      %22 = vector.broadcast %21 : vector<1x128xf32> to vector<128x128xf32>
      %23 = arith.addf %20, %22 : vector<128x128xf32>
      %c0_20 = arith.constant 0 : index
      %c0_21 = arith.constant 0 : index
      %24 = vector.load %arg8[%c0_20, %c0_21] : memref<128x128xf32, #tpu.memory_space<vmem>>, vector<128x128xf32>
      %cst_22 = arith.constant dense<0.000000e+00> : vector<128x128xf32>
      %25 = tpu.matmul %23, %24, %cst_22 {dimension_numbers = #tpu.dot_dimension_numbers<[1], [0], [0], [1], [0, 0, 1, 1], [], []>} : vector<128x128xf32>, vector<128x128xf32>, vector<128x128xf32> -> vector<128x128xf32>
      %c0_23 = arith.constant 0 : index
      %c0_24 = arith.constant 0 : index
      %26 = vector.load %arg9[%c0_23, %c0_24] : memref<1x128xf32, #tpu.memory_space<vmem>>, vector<1x128xf32>
      %27 = vector.broadcast %26 : vector<1x128xf32> to vector<128x128xf32>
      %28 = arith.addf %25, %27 : vector<128x128xf32>
      %29 = arith.negf %28 : vector<128x128xf32>
      %30 = math.exp %29 : vector<128x128xf32>
      %cst_25 = arith.constant 1.000000e+00 : f32
      %31 = vector.broadcast %cst_25 : f32 to vector<128x128xf32>
      %32 = arith.addf %31, %30 : vector<128x128xf32>
      %33 = arith.divf %31, %32 : vector<128x128xf32>
      %c0_26 = arith.constant 0 : index
      %c0_27 = arith.constant 0 : index
      %34 = vector.load %arg10[%c0_26, %c0_27] : memref<128x128xf32, #tpu.memory_space<vmem>>, vector<128x128xf32>
      tpu.vector_store %arg10[%c0_26, %c0_27], %33 {strides = array<i32>} : memref<128x128xf32, #tpu.memory_space<vmem>>, vector<128x128xf32>,
    } else {
    }
    return
  }
  func.func @transform_0(%arg0: i32, %arg1: i32) -> (i32, i32) {
    %c0_i32 = arith.constant 0 : i32
    return %arg0, %arg1 : i32, i32
  }
  func.func @transform_1(%arg0: i32, %arg1: i32) -> (i32, i32) {
    %c0_i32 = arith.constant 0 : i32
    %c0_i32_0 = arith.constant 0 : i32
    return %arg1, %c0_i32 : i32, i32
  }
  func.func @transform_2(%arg0: i32, %arg1: i32) -> (i32, i32) {
    %c0_i32 = arith.constant 0 : i32
    %c0_i32_0 = arith.constant 0 : i32
    return %arg0, %c0_i32 : i32, i32
  }
  func.func @transform_3(%arg0: i32, %arg1: i32) -> (i32, i32) {
    %c0_i32 = arith.constant 0 : i32
    %c0_i32_0 = arith.constant 0 : i32
    return %arg0, %c0_i32 : i32, i32
  }
  func.func @transform_4(%arg0: i32, %arg1: i32) -> (i32, i32) {
    %c0_i32 = arith.constant 0 : i32
    %c0_i32_0 = arith.constant 0 : i32
    %c0_i32_1 = arith.constant 0 : i32
    return %c0_i32, %c0_i32_0 : i32, i32
  }
  func.func @transform_5(%arg0: i32, %arg1: i32) -> (i32, i32) {
    %c0_i32 = arith.constant 0 : i32
    %c0_i32_0 = arith.constant 0 : i32
    %c0_i32_1 = arith.constant 0 : i32
    return %c0_i32, %c0_i32_0 : i32, i32
  }
  func.func @transform_6(%arg0: i32, %arg1: i32) -> (i32, i32) {
    %c0_i32 = arith.constant 0 : i32
    %c0_i32_0 = arith.constant 0 : i32
    %c0_i32_1 = arith.constant 0 : i32
    return %c0_i32, %c0_i32_0 : i32, i32
  }
  func.func @transform_7(%arg0: i32, %arg1: i32) -> (i32, i32) {
    %c0_i32 = arith.constant 0 : i32
    %c0_i32_0 = arith.constant 0 : i32
    %c0_i32_1 = arith.constant 0 : i32
    return %c0_i32, %c0_i32_0 : i32, i32
  }
  func.func @transform_8(%arg0: i32, %arg1: i32) -> (i32, i32) {
    %c0_i32 = arith.constant 0 : i32
    %c0_i32_0 = arith.constant 0 : i32
    return %arg0, %c0_i32 : i32, i32
  }
}

</mosaic_0001>

<bundles_post_ra>
// kernel: sage_forward.8
= control target key start
LH: loop header
LB: loop body
LE: loop exit
PB: predicated region body
PF: predicated region fallthrough
CT: control target
= control target key end

     0   :  { %s936_s1 = inlined_call_operand.vmem [shape: bf16[128,128], index: 1, kind: input, shape index: {}]   ;;  %s937_s2 = inlined_call_operand.vmem [shape: bf16[128,128], index: 2, kind: input, shape index: {}]   ;;  %s938_s0 = inlined_call_operand.vmem [shape: bf16[128,128], index: 0, kind: input, shape index: {}]   ;;  %s939_s3 = inlined_call_operand.vmem [shape: f32[1,128], index: 3, kind: input, shape index: {}]   ;;  %s940_s5 = inlined_call_operand.vmem [shape: f32[128,128], index: 5, kind: output, shape index: {1}]   ;;  %s941_s4 = inlined_call_operand.vmem [shape: bf16[128,128], index: 4, kind: output, shape index: {0}]  }
   0x1   :  { %v717_v0 = vld [vmem:[%s936_s1] sm:$0xff]   ;;  %v719_v2 = vld [vmem:[%s936_s1 + $0x8] sm:$0xff]   ;;  %v721_v4 = vld [vmem:[%s936_s1 + $0x10] sm:$0xff]  }
   0x2   :  { %v718_v1 = vld [vmem:[%s937_s2] sm:$0xff]   ;;  %653 = vmatprep.subr.bf16.mxu0 %v717_v0  ;;  %v720_v3 = vld [vmem:[%s937_s2 + $0x8] sm:$0xff]   ;;  %v722_v5 = vld [vmem:[%s937_s2 + $0x10] sm:$0xff]  }
   0x3   :  { %685 = vmatprep.subr.bf16.mxu1 %v718_v1  ;;  %654 = vmatpush3.bf16.msra.mxu0 %v717_v0  ;;  %v723_v6 = vld [vmem:[%s936_s1 + $0x18] sm:$0xff]   ;;  %v725_v8 = vld [vmem:[%s936_s1 + $0x20] sm:$0xff]   ;;  %v727_v10 = vld [vmem:[%s936_s1 + $0x28] sm:$0xff]  }
   0x4   :  { %686 = vmatpush3.bf16.msra.mxu1 %v718_v1  ;;  %655 = vmatprep.subr.bf16.mxu0 %v719_v2  ;;  %v724_v7 = vld [vmem:[%s937_s2 + $0x18] sm:$0xff]   ;;  %v726_v9 = vld [vmem:[%s937_s2 + $0x20] sm:$0xff]   ;;  %v728_v12 = vld [vmem:[%s937_s2 + $0x28] sm:$0xff]  }
   0x5   :  { %687 = vmatprep.subr.bf16.mxu1 %v720_v3  ;;  %v733_v11 = vld [vmem:[%s938_s0] sm:$0xff]   ;;  %v729_v13 = vld [vmem:[%s936_s1 + $0x30] sm:$0xff]   ;;  %v731_v15 = vld [vmem:[%s936_s1 + $0x38] sm:$0xff]  }
   0x6   :  { %669 = vmatprep.mubr.bf16.mxu0 %v733_v11  ;;  %701 = vmatprep.mubr.bf16.mxu1 %v733_v11  ;;  %v730_v14 = vld [vmem:[%s937_s2 + $0x30] sm:$0xff]   ;;  %v732_v16 = vld [vmem:[%s937_s2 + $0x38] sm:$0xff]   ;;  %v734_v17 = vld [vmem:[%s938_s0 + $0x8] sm:$0xff]  }
   0x7   :  { %656 = vmatpush3.bf16.msra.mxu0 %v719_v2  ;;  %v735_v18 = vld [vmem:[%s938_s0 + $0x10] sm:$0xff]   ;;  %v736_v19 = vld [vmem:[%s938_s0 + $0x18] sm:$0xff]   ;;  %v737_v20 = vld [vmem:[%s938_s0 + $0x20] sm:$0xff]  }
   0x8   :  { %688 = vmatpush3.bf16.msra.mxu1 %v720_v3  ;;  %657 = vmatprep.subr.bf16.mxu0 %v721_v4  ;;  %v738_v21 = vld [vmem:[%s938_s0 + $0x28] sm:$0xff]   ;;  %v739_v22 = vld [vmem:[%s938_s0 + $0x30] sm:$0xff]   ;;  %v740_v23 = vld [vmem:[%s938_s0 + $0x38] sm:$0xff]  }
   0x9   :  { %689 = vmatprep.subr.bf16.mxu1 %v722_v5  ;;  %v846_v24 = vld [vmem:[%s939_s3] ss:$0 sm:$0xff] }
   0xb   :  { %658 = vmatpush3.bf16.msra.mxu0 %v721_v4 }
   0xc   :  { %690 = vmatpush3.bf16.msra.mxu1 %v722_v5  ;;  %659 = vmatprep.subr.bf16.mxu0 %v723_v6 }
   0xd   :  { %691 = vmatprep.subr.bf16.mxu1 %v724_v7 }
   0xf   :  { %660 = vmatpush3.bf16.msra.mxu0 %v723_v6 }
  0x10   :  { %692 = vmatpush3.bf16.msra.mxu1 %v724_v7  ;;  %661 = vmatprep.subr.bf16.mxu0 %v725_v8 }
  0x11   :  { %693 = vmatprep.subr.bf16.mxu1 %v726_v9 }
  0x13   :  { %662 = vmatpush3.bf16.msra.mxu0 %v725_v8 }
  0x14   :  { %694 = vmatpush3.bf16.msra.mxu1 %v726_v9  ;;  %663 = vmatprep.subr.bf16.mxu0 %v727_v10 }
  0x15   :  { %695 = vmatprep.subr.bf16.mxu1 %v728_v12 }
  0x17   :  { %664 = vmatpush3.bf16.msra.mxu0 %v727_v10 }
  0x18   :  { %696 = vmatpush3.bf16.msra.mxu1 %v728_v12  ;;  %665 = vmatprep.subr.bf16.mxu0 %v729_v13 }
  0x19   :  { %697 = vmatprep.subr.bf16.mxu1 %v730_v14 }
  0x1b   :  { %666 = vmatpush3.bf16.msra.mxu0 %v729_v13 }
  0x1c   :  { %698 = vmatpush3.bf16.msra.mxu1 %v730_v14  ;;  %667 = vmatprep.subr.bf16.mxu0 %v731_v15 }
  0x1d   :  { %699 = vmatprep.subr.bf16.mxu1 %v732_v16 }
  0x1f   :  { %668 = vmatpush3.bf16.msra.mxu0 %v731_v15 }
  0x20   :  { %700 = vmatpush3.bf16.msra.mxu1 %v732_v16 }
  0x22   :  { %670 = vmatmul.mubr.bf16.vlgmr.msra.gmra.mrb[0].mxu0 %v734_v17 }
  0x23   :  { %702 = vmatmul.mubr.bf16.vlgmr.msra.gmra.mrb[0].mxu1 %v734_v17  ;;  %673 = vmatprep.mubr.bf16.mxu0 %v735_v18 }
  0x24   :  { %705 = vmatprep.mubr.bf16.mxu1 %v735_v18 }
  0x2a   :  { %674 = vmatmul.mubr.bf16.gmra.mrb[4].mxu0 %v736_v19 }
  0x2b   :  { %706 = vmatmul.mubr.bf16.gmra.mrb[4].mxu1 %v736_v19  ;;  %677 = vmatprep.mubr.bf16.mxu0 %v737_v20 }
  0x2c   :  { %709 = vmatprep.mubr.bf16.mxu1 %v737_v20 }
  0x32   :  { %678 = vmatmul.mubr.bf16.gmra.mrb[8].mxu0 %v738_v21 }
  0x33   :  { %710 = vmatmul.mubr.bf16.gmra.mrb[8].mxu1 %v738_v21  ;;  %681 = vmatprep.mubr.bf16.mxu0 %v739_v22 }
  0x34   :  { %713 = vmatprep.mubr.bf16.mxu1 %v739_v22 }
  0x3a   :  { %682 = vmatmul.mubr.bf16.gmra.mrb[12].mxu0 %v740_v23 }
  0x3b   :  { %714 = vmatmul.mubr.bf16.gmra.mrb[12].mxu1 %v740_v23 }
  0xf5   :  { %v671_v25 = vpop.f32.mrb[0].mxu0 }
  0xf6   :  { %v703_v26 = vpop.f32.mrb[0].mxu1  ;;  %v182_v27 = vpop.f32.mrb[1].mxu0 }
  0xf7   :  { %v439_v28 = vadd.f32 %v703_v26, %v846_v24  ;;  %v430_v29 = vpop.f32.mrb[1].mxu1  ;;  %v672_v30 = vpop.f32.mrb[2].mxu0 }
  0xf8   :  { %v431_v31 = vadd.f32 %v846_v24, %v430_v29  ;;  %v582_v32 = vpack.c.bf16 %v672_v30, %v671_v25  ;;  %v704_v33 = vpop.f32.mrb[2].mxu1  ;;  %v185_v34 = vpop.f32.mrb[3].mxu0 }
  0xf9   :  { %495 = vst [vmem:[%s940_s5 + $0x10] sm:$0xff] %v439_v28  ;;  %v442_v35 = vadd.f32 %v704_v33, %v846_v24  ;;  %v577_v36 = vpack.c.bf16 %v185_v34, %v182_v27  ;;  %v433_v37 = vpop.f32.mrb[3].mxu1 }
  0xfa   :  { %493 = vst [vmem:[%s940_s5] sm:$0xff] %v431_v31  ;;  %614 = vst [vmem:[%s941_s4 + $0x8] sm:$0xff] %v582_v32   ;;  %v434_v38 = vadd.f32 %v846_v24, %v433_v37 }
  0xfb   :  { %496 = vst [vmem:[%s940_s5 + $0x18] sm:$0xff] %v442_v35  ;;  %578 = vst [vmem:[%s941_s4] sm:$0xff] %v577_v36  }
  0xfc   :  { %494 = vst [vmem:[%s940_s5 + $0x8] sm:$0xff] %v434_v38 }
  0xfd   :  { %v675_v39 = vpop.f32.mrb[4].mxu0 }
  0xfe   :  { %v707_v40 = vpop.f32.mrb[4].mxu1  ;;  %v198_v41 = vpop.f32.mrb[5].mxu0 }
  0xff   :  { %v455_v42 = vadd.f32 %v707_v40, %v846_v24  ;;  %v446_v43 = vpop.f32.mrb[5].mxu1  ;;  %v676_v44 = vpop.f32.mrb[6].mxu0 }
 0x100   :  { %v447_v45 = vadd.f32 %v846_v24, %v446_v43  ;;  %v592_v46 = vpack.c.bf16 %v676_v44, %v675_v39  ;;  %v708_v47 = vpop.f32.mrb[6].mxu1  ;;  %v201_v48 = vpop.f32.mrb[7].mxu0 }
 0x101   :  { %499 = vst [vmem:[%s940_s5 + $0x30] sm:$0xff] %v455_v42  ;;  %v458_v49 = vadd.f32 %v708_v47, %v846_v24  ;;  %v587_v50 = vpack.c.bf16 %v201_v48, %v198_v41  ;;  %v449_v51 = vpop.f32.mrb[7].mxu1 }
 0x102   :  { %497 = vst [vmem:[%s940_s5 + $0x20] sm:$0xff] %v447_v45  ;;  %616 = vst [vmem:[%s941_s4 + $0x18] sm:$0xff] %v592_v46   ;;  %v450_v52 = vadd.f32 %v846_v24, %v449_v51 }
 0x103   :  { %500 = vst [vmem:[%s940_s5 + $0x38] sm:$0xff] %v458_v49  ;;  %615 = vst [vmem:[%s941_s4 + $0x10] sm:$0xff] %v587_v50  }
 0x104   :  { %498 = vst [vmem:[%s940_s5 + $0x28] sm:$0xff] %v450_v52 }
 0x105   :  { %v679_v53 = vpop.f32.mrb[8].mxu0 }
 0x106   :  { %v711_v54 = vpop.f32.mrb[8].mxu1  ;;  %v214_v55 = vpop.f32.mrb[9].mxu0 }
 0x107   :  { %v471_v56 = vadd.f32 %v711_v54, %v846_v24  ;;  %v462_v57 = vpop.f32.mrb[9].mxu1  ;;  %v680_v58 = vpop.f32.mrb[10].mxu0 }
 0x108   :  { %v463_v59 = vadd.f32 %v846_v24, %v462_v57  ;;  %v602_v60 = vpack.c.bf16 %v680_v58, %v679_v53  ;;  %v712_v61 = vpop.f32.mrb[10].mxu1  ;;  %v217_v62 = vpop.f32.mrb[11].mxu0 }
 0x109   :  { %503 = vst [vmem:[%s940_s5 + $0x50] sm:$0xff] %v471_v56  ;;  %v474_v63 = vadd.f32 %v712_v61, %v846_v24  ;;  %v597_v0 = vpack.c.bf16 %v217_v62, %v214_v55  ;;  %v465_v1 = vpop.f32.mrb[11].mxu1 }
 0x10a   :  { %501 = vst [vmem:[%s940_s5 + $0x40] sm:$0xff] %v463_v59  ;;  %618 = vst [vmem:[%s941_s4 + $0x28] sm:$0xff] %v602_v60   ;;  %v466_v2 = vadd.f32 %v846_v24, %v465_v1 }
 0x10b   :  { %504 = vst [vmem:[%s940_s5 + $0x58] sm:$0xff] %v474_v63  ;;  %617 = vst [vmem:[%s941_s4 + $0x20] sm:$0xff] %v597_v0  }
 0x10c   :  { %502 = vst [vmem:[%s940_s5 + $0x48] sm:$0xff] %v466_v2 }
 0x10d   :  { %v683_v3 = vpop.f32.mrb[12].mxu0 }
 0x10e   :  { %v715_v4 = vpop.f32.mrb[12].mxu1  ;;  %v230_v5 = vpop.f32.mrb[13].mxu0 }
 0x10f   :  { %v487_v6 = vadd.f32 %v715_v4, %v846_v24  ;;  %v478_v7 = vpop.f32.mrb[13].mxu1  ;;  %v684_v8 = vpop.f32.mrb[14].mxu0 }
 0x110   :  { %v479_v9 = vadd.f32 %v846_v24, %v478_v7  ;;  %v612_v10 = vpack.c.bf16 %v684_v8, %v683_v3  ;;  %v716_v11 = vpop.f32.mrb[14].mxu1  ;;  %v233_v12 = vpop.f32.mrb[15].mxu0 }
 0x111   :  { %507 = vst [vmem:[%s940_s5 + $0x70] sm:$0xff] %v487_v6  ;;  %v490_v13 = vadd.f32 %v716_v11, %v846_v24  ;;  %v607_v14 = vpack.c.bf16 %v233_v12, %v230_v5  ;;  %v481_v15 = vpop.f32.mrb[15].mxu1 }
 0x112   :  { %505 = vst [vmem:[%s940_s5 + $0x60] sm:$0xff] %v479_v9  ;;  %620 = vst [vmem:[%s941_s4 + $0x38] sm:$0xff] %v612_v10   ;;  %v482_v16 = vadd.f32 %v846_v24, %v481_v15 }
 0x113   :  { %508 = vst [vmem:[%s940_s5 + $0x78] sm:$0xff] %v490_v13  ;;  %619 = vst [vmem:[%s941_s4 + $0x30] sm:$0xff] %v607_v14  }
 0x114   :  { %506 = vst [vmem:[%s940_s5 + $0x68] sm:$0xff] %v482_v16 }

// kernel: sage_forward.6
= control target key start
LH: loop header
LB: loop body
LE: loop exit
PB: predicated region body
PF: predicated region fallthrough
CT: control target
= control target key end

     0   :  { %11 = vsyncpa [#allocation3], 0  ;;  %s783_s18 = smov [#allocation2]   ;;  %s969_s0 = inlined_call_operand.vmem [shape: bf16[128,128], index: 0, kind: input, shape index: {}]   ;;  %s970_s1 = inlined_call_operand.vmem [shape: bf16[128,128], index: 1, kind: input, shape index: {}]   ;;  %s971_s2 = inlined_call_operand.hbm [shape: bf16[128,128], index: 2, kind: input, shape index: {}]   ;;  %s972_s3 = inlined_call_operand.vmem [shape: f32[1,128], index: 3, kind: input, shape index: {}]   ;;  %s973_s4 = inlined_call_operand.vmem [shape: bf16[128,128], index: 4, kind: output, shape index: {0}]   ;;  %s974_s5 = inlined_call_operand.vmem [shape: f32[128,128], index: 5, kind: output, shape index: {1}]  }
   0x1   :  { %s21_s19 = sshll.u32 %s783_s18, 4  ;;  %s759_s22 = scalar_lea.hbm %s971_s2, 1024  ;;  %s22_s19 = int_to_ptr.vmem [resolvable:$true] %s21_s19 }
   0x2   :  { %p760_p0 = scmp.ne.s32.totalorder %s971_s2, %s759_s22  ;;  %p763_p1 = scmp.lt.u32.totalorder %s759_s22, %s971_s2 }
   0x4   :  { %p765_p2 = pnand %p763_p1, %p760_p0 }
   0x6   :  { %768 = shalt.err (!%p765_p2)
}
   0x7   :  { %s769_s27 = scalar_lea.vmem %s22_s19, 1024  ;;  %p774_p4 = scmp.lt.s32.totalorder %s22_s19, %s22_s19 }
   0x8   :  { %p770_p3 = scmp.ne.s32.totalorder %s22_s19, %s769_s27  ;;  %p775_p5 = scmp.lt.s32.totalorder %s769_s27, %s769_s27 }
   0xa   :  { %p776_p6 = por %p775_p5, %p774_p4 }
   0xc   :  { %p777_p7 = pnand %p776_p6, %p770_p3 }
   0xe   :  { %780 = shalt.err (!%p777_p7)
}
   0xf   :  { %s784_s28 = smov 64   ;;  %s785_s29 = smov 4  }
  0x10   :  { %27 = dma.hbm_to_vmem [thread:$0]  %s971_s2, 1024, %s22_s19, [#allocation3], %s784_s28, %s784_s28, %s785_s29  }
  0x11   :  { %781 = dma.done.wait [#allocation3], 1024  }
  0x12   :  { %782 = vsyncadd [#allocation3], 4294966272  ;;  %v735_v0 = vld [vmem:[%s970_s1] sm:$0xff]   ;;  %v737_v2 = vld [vmem:[%s970_s1 + $0x8] sm:$0xff]  }
  0x13   :  { %v736_v1 = vld [vmem:[#allocation2] sm:$0xff]   ;;  %668 = vmatprep.subr.bf16.mxu0 %v735_v0  ;;  %v738_v3 = vld [vmem:[#allocation2 + $0x8] sm:$0xff]   ;;  %v739_v4 = vld [vmem:[%s970_s1 + $0x10] sm:$0xff]  }
  0x14   :  { %700 = vmatprep.subr.bf16.mxu1 %v736_v1  ;;  %669 = vmatpush3.bf16.msra.mxu0 %v735_v0  ;;  %v740_v5 = vld [vmem:[#allocation2 + $0x10] sm:$0xff]   ;;  %v741_v6 = vld [vmem:[%s970_s1 + $0x18] sm:$0xff]   ;;  %v743_v8 = vld [vmem:[%s970_s1 + $0x20] sm:$0xff]  }
  0x15   :  { %701 = vmatpush3.bf16.msra.mxu1 %v736_v1  ;;  %670 = vmatprep.subr.bf16.mxu0 %v737_v2  ;;  %v742_v7 = vld [vmem:[#allocation2 + $0x18] sm:$0xff]   ;;  %v744_v9 = vld [vmem:[#allocation2 + $0x20] sm:$0xff]   ;;  %v745_v10 = vld [vmem:[%s970_s1 + $0x28] sm:$0xff]  }
  0x16   :  { %702 = vmatprep.subr.bf16.mxu1 %v738_v3  ;;  %v751_v11 = vld [vmem:[%s969_s0] sm:$0xff]   ;;  %v746_v12 = vld [vmem:[#allocation2 + $0x28] sm:$0xff]   ;;  %v747_v13 = vld [vmem:[%s970_s1 + $0x30] sm:$0xff]  }
  0x17   :  { %684 = vmatprep.mubr.bf16.mxu0 %v751_v11  ;;  %716 = vmatprep.mubr.bf16.mxu1 %v751_v11  ;;  %v748_v14 = vld [vmem:[#allocation2 + $0x30] sm:$0xff]   ;;  %v749_v15 = vld [vmem:[%s970_s1 + $0x38] sm:$0xff]   ;;  %v752_v17 = vld [vmem:[%s969_s0 + $0x8] sm:$0xff]  }
  0x18   :  { %671 = vmatpush3.bf16.msra.mxu0 %v737_v2  ;;  %v750_v16 = vld [vmem:[#allocation2 + $0x38] sm:$0xff]   ;;  %v753_v18 = vld [vmem:[%s969_s0 + $0x10] sm:$0xff]   ;;  %v755_v20 = vld [vmem:[%s969_s0 + $0x20] sm:$0xff]  }
  0x19   :  { %703 = vmatpush3.bf16.msra.mxu1 %v738_v3  ;;  %672 = vmatprep.subr.bf16.mxu0 %v739_v4  ;;  %v754_v19 = vld [vmem:[%s969_s0 + $0x18] sm:$0xff]   ;;  %v756_v21 = vld [vmem:[%s969_s0 + $0x28] sm:$0xff]   ;;  %v757_v22 = vld [vmem:[%s969_s0 + $0x30] sm:$0xff]  }
  0x1a   :  { %704 = vmatprep.subr.bf16.mxu1 %v740_v5  ;;  %v758_v23 = vld [vmem:[%s969_s0 + $0x38] sm:$0xff]   ;;  %v879_v24 = vld [vmem:[%s972_s3] ss:$0 sm:$0xff] }
  0x1c   :  { %673 = vmatpush3.bf16.msra.mxu0 %v739_v4 }
  0x1d   :  { %705 = vmatpush3.bf16.msra.mxu1 %v740_v5  ;;  %674 = vmatprep.subr.bf16.mxu0 %v741_v6 }
  0x1e   :  { %706 = vmatprep.subr.bf16.mxu1 %v742_v7 }
  0x20   :  { %675 = vmatpush3.bf16.msra.mxu0 %v741_v6 }
  0x21   :  { %707 = vmatpush3.bf16.msra.mxu1 %v742_v7  ;;  %676 = vmatprep.subr.bf16.mxu0 %v743_v8 }
  0x22   :  { %708 = vmatprep.subr.bf16.mxu1 %v744_v9 }
  0x24   :  { %677 = vmatpush3.bf16.msra.mxu0 %v743_v8 }
  0x25   :  { %709 = vmatpush3.bf16.msra.mxu1 %v744_v9  ;;  %678 = vmatprep.subr.bf16.mxu0 %v745_v10 }
  0x26   :  { %710 = vmatprep.subr.bf16.mxu1 %v746_v12 }
  0x28   :  { %679 = vmatpush3.bf16.msra.mxu0 %v745_v10 }
  0x29   :  { %711 = vmatpush3.bf16.msra.mxu1 %v746_v12  ;;  %680 = vmatprep.subr.bf16.mxu0 %v747_v13 }
  0x2a   :  { %712 = vmatprep.subr.bf16.mxu1 %v748_v14 }
  0x2c   :  { %681 = vmatpush3.bf16.msra.mxu0 %v747_v13 }
  0x2d   :  { %713 = vmatpush3.bf16.msra.mxu1 %v748_v14  ;;  %682 = vmatprep.subr.bf16.mxu0 %v749_v15 }
  0x2e   :  { %714 = vmatprep.subr.bf16.mxu1 %v750_v16 }
  0x30   :  { %683 = vmatpush3.bf16.msra.mxu0 %v749_v15 }
  0x31   :  { %715 = vmatpush3.bf16.msra.mxu1 %v750_v16 }
  0x33   :  { %685 = vmatmul.mubr.bf16.vlgmr.msra.gmra.mrb[0].mxu0 %v752_v17 }
  0x34   :  { %717 = vmatmul.mubr.bf16.vlgmr.msra.gmra.mrb[0].mxu1 %v752_v17  ;;  %688 = vmatprep.mubr.bf16.mxu0 %v753_v18 }
  0x35   :  { %720 = vmatprep.mubr.bf16.mxu1 %v753_v18 }
  0x3b   :  { %689 = vmatmul.mubr.bf16.gmra.mrb[4].mxu0 %v754_v19 }
  0x3c   :  { %721 = vmatmul.mubr.bf16.gmra.mrb[4].mxu1 %v754_v19  ;;  %692 = vmatprep.mubr.bf16.mxu0 %v755_v20 }
  0x3d   :  { %724 = vmatprep.mubr.bf16.mxu1 %v755_v20 }
  0x43   :  { %693 = vmatmul.mubr.bf16.gmra.mrb[8].mxu0 %v756_v21 }
  0x44   :  { %725 = vmatmul.mubr.bf16.gmra.mrb[8].mxu1 %v756_v21  ;;  %696 = vmatprep.mubr.bf16.mxu0 %v757_v22 }
  0x45   :  { %728 = vmatprep.mubr.bf16.mxu1 %v757_v22 }
  0x4b   :  { %697 = vmatmul.mubr.bf16.gmra.mrb[12].mxu0 %v758_v23 }
  0x4c   :  { %729 = vmatmul.mubr.bf16.gmra.mrb[12].mxu1 %v758_v23 }
 0x106   :  { %v686_v25 = vpop.f32.mrb[0].mxu0 }
 0x107   :  { %v718_v26 = vpop.f32.mrb[0].mxu1  ;;  %v196_v27 = vpop.f32.mrb[1].mxu0 }
 0x108   :  { %v453_v28 = vadd.f32 %v718_v26, %v879_v24  ;;  %v444_v29 = vpop.f32.mrb[1].mxu1  ;;  %v687_v30 = vpop.f32.mrb[2].mxu0 }
 0x109   :  { %v445_v31 = vadd.f32 %v879_v24, %v444_v29  ;;  %v597_v32 = vpack.c.bf16 %v687_v30, %v686_v25  ;;  %v719_v33 = vpop.f32.mrb[2].mxu1  ;;  %v199_v34 = vpop.f32.mrb[3].mxu0 }
 0x10a   :  { %509 = vst [vmem:[%s974_s5 + $0x10] sm:$0xff] %v453_v28  ;;  %v456_v35 = vadd.f32 %v719_v33, %v879_v24  ;;  %v592_v36 = vpack.c.bf16 %v199_v34, %v196_v27  ;;  %v447_v37 = vpop.f32.mrb[3].mxu1 }
 0x10b   :  { %507 = vst [vmem:[%s974_s5] sm:$0xff] %v445_v31  ;;  %629 = vst [vmem:[%s973_s4 + $0x8] sm:$0xff] %v597_v32   ;;  %v448_v38 = vadd.f32 %v879_v24, %v447_v37 }
 0x10c   :  { %510 = vst [vmem:[%s974_s5 + $0x18] sm:$0xff] %v456_v35  ;;  %593 = vst [vmem:[%s973_s4] sm:$0xff] %v592_v36  }
 0x10d   :  { %508 = vst [vmem:[%s974_s5 + $0x8] sm:$0xff] %v448_v38 }
 0x10e   :  { %v690_v39 = vpop.f32.mrb[4].mxu0 }
 0x10f   :  { %v722_v40 = vpop.f32.mrb[4].mxu1  ;;  %v212_v41 = vpop.f32.mrb[5].mxu0 }
 0x110   :  { %v469_v42 = vadd.f32 %v722_v40, %v879_v24  ;;  %v460_v43 = vpop.f32.mrb[5].mxu1  ;;  %v691_v44 = vpop.f32.mrb[6].mxu0 }
 0x111   :  { %v461_v45 = vadd.f32 %v879_v24, %v460_v43  ;;  %v607_v46 = vpack.c.bf16 %v691_v44, %v690_v39  ;;  %v723_v47 = vpop.f32.mrb[6].mxu1  ;;  %v215_v48 = vpop.f32.mrb[7].mxu0 }
 0x112   :  { %513 = vst [vmem:[%s974_s5 + $0x30] sm:$0xff] %v469_v42  ;;  %v472_v49 = vadd.f32 %v723_v47, %v879_v24  ;;  %v602_v50 = vpack.c.bf16 %v215_v48, %v212_v41  ;;  %v463_v51 = vpop.f32.mrb[7].mxu1 }
 0x113   :  { %511 = vst [vmem:[%s974_s5 + $0x20] sm:$0xff] %v461_v45  ;;  %631 = vst [vmem:[%s973_s4 + $0x18] sm:$0xff] %v607_v46   ;;  %v464_v52 = vadd.f32 %v879_v24, %v463_v51 }
 0x114   :  { %514 = vst [vmem:[%s974_s5 + $0x38] sm:$0xff] %v472_v49  ;;  %630 = vst [vmem:[%s973_s4 + $0x10] sm:$0xff] %v602_v50  }
 0x115   :  { %512 = vst [vmem:[%s974_s5 + $0x28] sm:$0xff] %v464_v52 }
 0x116   :  { %v694_v53 = vpop.f32.mrb[8].mxu0 }
 0x117   :  { %v726_v54 = vpop.f32.mrb[8].mxu1  ;;  %v228_v55 = vpop.f32.mrb[9].mxu0 }
 0x118   :  { %v485_v56 = vadd.f32 %v726_v54, %v879_v24  ;;  %v476_v57 = vpop.f32.mrb[9].mxu1  ;;  %v695_v58 = vpop.f32.mrb[10].mxu0 }
 0x119   :  { %v477_v59 = vadd.f32 %v879_v24, %v476_v57  ;;  %v617_v60 = vpack.c.bf16 %v695_v58, %v694_v53  ;;  %v727_v61 = vpop.f32.mrb[10].mxu1  ;;  %v231_v62 = vpop.f32.mrb[11].mxu0 }
 0x11a   :  { %517 = vst [vmem:[%s974_s5 + $0x50] sm:$0xff] %v485_v56  ;;  %v488_v63 = vadd.f32 %v727_v61, %v879_v24  ;;  %v612_v0 = vpack.c.bf16 %v231_v62, %v228_v55  ;;  %v479_v1 = vpop.f32.mrb[11].mxu1 }
 0x11b   :  { %515 = vst [vmem:[%s974_s5 + $0x40] sm:$0xff] %v477_v59  ;;  %633 = vst [vmem:[%s973_s4 + $0x28] sm:$0xff] %v617_v60   ;;  %v480_v2 = vadd.f32 %v879_v24, %v479_v1 }
 0x11c   :  { %518 = vst [vmem:[%s974_s5 + $0x58] sm:$0xff] %v488_v63  ;;  %632 = vst [vmem:[%s973_s4 + $0x20] sm:$0xff] %v612_v0  }
 0x11d   :  { %516 = vst [vmem:[%s974_s5 + $0x48] sm:$0xff] %v480_v2 }
 0x11e   :  { %v698_v3 = vpop.f32.mrb[12].mxu0 }
 0x11f   :  { %v730_v4 = vpop.f32.mrb[12].mxu1  ;;  %v244_v5 = vpop.f32.mrb[13].mxu0 }
 0x120   :  { %v501_v6 = vadd.f32 %v730_v4, %v879_v24  ;;  %v492_v7 = vpop.f32.mrb[13].mxu1  ;;  %v699_v8 = vpop.f32.mrb[14].mxu0 }
 0x121   :  { %v493_v9 = vadd.f32 %v879_v24, %v492_v7  ;;  %v627_v10 = vpack.c.bf16 %v699_v8, %v698_v3  ;;  %v731_v11 = vpop.f32.mrb[14].mxu1  ;;  %v247_v12 = vpop.f32.mrb[15].mxu0 }
 0x122   :  { %521 = vst [vmem:[%s974_s5 + $0x70] sm:$0xff] %v501_v6  ;;  %v504_v13 = vadd.f32 %v731_v11, %v879_v24  ;;  %v622_v14 = vpack.c.bf16 %v247_v12, %v244_v5  ;;  %v495_v15 = vpop.f32.mrb[15].mxu1 }
 0x123   :  { %519 = vst [vmem:[%s974_s5 + $0x60] sm:$0xff] %v493_v9  ;;  %635 = vst [vmem:[%s973_s4 + $0x38] sm:$0xff] %v627_v10   ;;  %v496_v16 = vadd.f32 %v879_v24, %v495_v15 }
 0x124   :  { %522 = vst [vmem:[%s974_s5 + $0x78] sm:$0xff] %v504_v13  ;;  %634 = vst [vmem:[%s973_s4 + $0x30] sm:$0xff] %v622_v14  }
 0x125   :  { %520 = vst [vmem:[%s974_s5 + $0x68] sm:$0xff] %v496_v16 }
 0x126   :  { %531 = vsyncpa [#allocation3], 1 }

// kernel: sage_forward.7
= control target key start
LH: loop header
LB: loop body
LE: loop exit
PB: predicated region body
PF: predicated region fallthrough
CT: control target
= control target key end

     0   :  { %v806_v1 = vmov 0   ;;  %s1070_s1 = inlined_call_operand.vmem [shape: bf16[128,128], index: 1, kind: input, shape index: {}]   ;;  %s1071_s0 = inlined_call_operand.vmem [shape: bf16[128,128], index: 0, kind: input, shape index: {}]   ;;  %s1072_s3 = inlined_call_operand.vmem [shape: f32[128,1], index: 3, kind: input, shape index: {}]   ;;  %s1073_s2 = inlined_call_operand.vmem [shape: f32[128,128], index: 2, kind: input, shape index: {}]   ;;  %s1074_s4 = inlined_call_operand.vmem [shape: f32[1,128], index: 4, kind: input, shape index: {}]   ;;  %s1075_s5 = inlined_call_operand.vmem [shape: f32[1,128], index: 5, kind: input, shape index: {}]   ;;  %s1076_s6 = inlined_call_operand.vmem [shape: bf16[128,128], index: 6, kind: output, shape index: {}]  }
   0x1   :  { %v790_v0 = vld [vmem:[%s1070_s1] sm:$0xff]   ;;  %789 = vset.pattern.permute.xlu1 %v806_v1  ;;  %788 = vset.pattern.permute.xlu0 %v806_v1  ;;  %v791_v2 = vld [vmem:[%s1070_s1 + $0x8] sm:$0xff]   ;;  %v792_v3 = vld [vmem:[%s1070_s1 + $0x10] sm:$0xff]  }
   0x2   :  { %739 = vmatprep.subr.bf16.mxu0 %v790_v0  ;;  %771 = vmatprep.subr.bf16.mxu1 %v790_v0  ;;  %v793_v4 = vld [vmem:[%s1070_s1 + $0x18] sm:$0xff]   ;;  %v798_v5 = vld [vmem:[%s1071_s0] sm:$0xff]   ;;  %v795_v8 = vld [vmem:[%s1070_s1 + $0x28] sm:$0xff]  }
   0x3   :  { %740 = vmatpush3.bf16.msra.mxu0 %v790_v0  ;;  %779 = vmatpush3.bf16.msra.mxu1 %v790_v0  ;;  %v799_v6 = vld [vmem:[%s1071_s0 + $0x20] sm:$0xff]   ;;  %v338_v9 = vld [vmem:[%s1072_s3 + $0x10] sm:$0xff]  ;;  %v339_v11 = vld [vmem:[%s1072_s3 + $0x18] sm:$0xff] }
   0x4   :  { %741 = vmatprep.subr.bf16.mxu0 %v791_v2  ;;  %772 = vmatprep.subr.bf16.mxu1 %v791_v2  ;;  %v794_v7 = vld [vmem:[%s1070_s1 + $0x20] sm:$0xff]   ;;  %v337_v12 = vld [vmem:[%s1072_s3 + $0x8] sm:$0xff]  ;;  %v796_v13 = vld [vmem:[%s1070_s1 + $0x30] sm:$0xff]  }
   0x5   :  { %755 = vmatprep.mubr.bf16.mxu0 %v798_v5  ;;  %763 = vmatprep.mubr.bf16.mxu1 %v799_v6  ;;  %v336_v10 = vld [vmem:[%s1072_s3] sm:$0xff]  ;;  %v341_v14 = vld [vmem:[%s1072_s3 + $0x28] sm:$0xff]  ;;  %v797_v16 = vld [vmem:[%s1070_s1 + $0x38] sm:$0xff]  }
   0x6   :  { %364 = vperm.xlu1 %789, %v338_v9   ;;  %354 = vperm.xlu0 %788, %v336_v10   ;;  %v340_v15 = vld [vmem:[%s1072_s3 + $0x20] sm:$0xff]  ;;  %v343_v17 = vld [vmem:[%s1072_s3 + $0x38] sm:$0xff]  ;;  %v342_v18 = vld [vmem:[%s1072_s3 + $0x30] sm:$0xff] }
   0x7   :  { %742 = vmatpush3.bf16.msra.mxu0 %v791_v2  ;;  %780 = vmatpush3.bf16.msra.mxu1 %v791_v2  ;;  %v800_v19 = vld [vmem:[%s1071_s0 + $0x8] sm:$0xff]   ;;  %v344_v22 = vld [vmem:[%s1072_s3 + $0x40] sm:$0xff]  ;;  %v802_v23 = vld [vmem:[%s1071_s0 + $0x10] sm:$0xff]  }
   0x8   :  { %743 = vmatprep.subr.bf16.mxu0 %v792_v3  ;;  %773 = vmatprep.subr.bf16.mxu1 %v792_v3  ;;  %v801_v20 = vld [vmem:[%s1071_s0 + $0x28] sm:$0xff]   ;;  %v803_v24 = vld [vmem:[%s1071_s0 + $0x30] sm:$0xff]   ;;  %v347_v25 = vld [vmem:[%s1072_s3 + $0x58] sm:$0xff] }
   0x9   :  { %v345_v21 = vld [vmem:[%s1072_s3 + $0x48] sm:$0xff]  ;;  %v346_v26 = vld [vmem:[%s1072_s3 + $0x50] sm:$0xff]  ;;  %v804_v27 = vld [vmem:[%s1071_s0 + $0x18] sm:$0xff]  }
   0xa   :  { %369 = vperm.xlu1 %789, %v339_v11   ;;  %359 = vperm.xlu0 %788, %v337_v12   ;;  %v805_v28 = vld [vmem:[%s1071_s0 + $0x38] sm:$0xff]   ;;  %v349_v29 = vld [vmem:[%s1072_s3 + $0x68] sm:$0xff]  ;;  %v348_v30 = vld [vmem:[%s1072_s3 + $0x60] sm:$0xff] }
   0xb   :  { %744 = vmatpush3.bf16.msra.mxu0 %v792_v3  ;;  %781 = vmatpush3.bf16.msra.mxu1 %v792_v3  ;;  %v351_v31 = vld [vmem:[%s1072_s3 + $0x78] sm:$0xff]  ;;  %v350_v32 = vld [vmem:[%s1072_s3 + $0x70] sm:$0xff]  ;;  %v448_v53 = vld [vmem:[%s1073_s2] sm:$0xff] }
   0xc   :  { %745 = vmatprep.subr.bf16.mxu0 %v793_v4  ;;  %774 = vmatprep.subr.bf16.mxu1 %v793_v4  ;;  %v450_v47 = vld [vmem:[%s1073_s2 + $0x10] sm:$0xff]  ;;  %v456_v55 = vld [vmem:[%s1073_s2 + $0x40] sm:$0xff]  ;;  %v451_v59 = vld [vmem:[%s1073_s2 + $0x18] sm:$0xff] }
   0xd   :  { %v458_v49 = vld [vmem:[%s1073_s2 + $0x50] sm:$0xff]  ;;  %v459_v61 = vld [vmem:[%s1073_s2 + $0x58] sm:$0xff]  ;;  %v449_v3 = vld [vmem:[%s1073_s2 + $0x8] sm:$0xff] }
   0xe   :  { %379 = vperm.xlu1 %789, %v341_v14   ;;  %374 = vperm.xlu0 %788, %v340_v15   ;;  %v457_v5 = vld [vmem:[%s1073_s2 + $0x48] sm:$0xff]  ;;  %v975_v6 = vld [vmem:[%s1074_s4] ss:$0 sm:$0xff] }
   0xf   :  { %746 = vmatpush3.bf16.msra.mxu0 %v793_v4  ;;  %782 = vmatpush3.bf16.msra.mxu1 %v793_v4  ;;  %v980_v15 = vld [vmem:[%s1075_s5] ss:$0 sm:$0xff] }
  0x10   :  { %747 = vmatprep.subr.bf16.mxu0 %v794_v7  ;;  %775 = vmatprep.subr.bf16.mxu1 %v794_v7 }
  0x12   :  { %389 = vperm.xlu1 %789, %v343_v17   ;;  %384 = vperm.xlu0 %788, %v342_v18  }
  0x13   :  { %748 = vmatpush3.bf16.msra.mxu0 %v794_v7  ;;  %783 = vmatpush3.bf16.msra.mxu1 %v794_v7 }
  0x14   :  { %749 = vmatprep.subr.bf16.mxu0 %v795_v8  ;;  %776 = vmatprep.subr.bf16.mxu1 %v795_v8 }
  0x16   :  { %399 = vperm.xlu1 %789, %v345_v21   ;;  %394 = vperm.xlu0 %788, %v344_v22  }
  0x17   :  { %750 = vmatpush3.bf16.msra.mxu0 %v795_v8  ;;  %784 = vmatpush3.bf16.msra.mxu1 %v795_v8 }
  0x18   :  { %751 = vmatprep.subr.bf16.mxu0 %v796_v13  ;;  %777 = vmatprep.subr.bf16.mxu1 %v796_v13 }
  0x1a   :  { %409 = vperm.xlu1 %789, %v347_v25   ;;  %404 = vperm.xlu0 %788, %v346_v26  }
  0x1b   :  { %752 = vmatpush3.bf16.msra.mxu0 %v796_v13  ;;  %785 = vmatpush3.bf16.msra.mxu1 %v796_v13 }
  0x1c   :  { %753 = vmatprep.subr.bf16.mxu0 %v797_v16  ;;  %778 = vmatprep.subr.bf16.mxu1 %v797_v16 }
  0x1e   :  { %419 = vperm.xlu1 %789, %v349_v29   ;;  %414 = vperm.xlu0 %788, %v348_v30  }
  0x1f   :  { %754 = vmatpush3.bf16.msra.mxu0 %v797_v16  ;;  %786 = vmatpush3.bf16.msra.mxu1 %v797_v16 }
  0x22   :  { %756 = vmatmul.mubr.bf16.vlgmr.msra.gmra.mrb[0].mxu0 %v800_v19  ;;  %764 = vmatmul.mubr.bf16.vlgmr.msra.gmra.mrb[0].mxu1 %v801_v20 }
  0x23   :  { %759 = vmatprep.mubr.bf16.mxu0 %v802_v23  ;;  %767 = vmatprep.mubr.bf16.mxu1 %v803_v24 }
  0x24   :  { %429 = vperm.xlu1 %789, %v351_v31   ;;  %424 = vperm.xlu0 %788, %v350_v32  }
  0x2a   :  { %760 = vmatmul.mubr.bf16.gmra.mrb[4].mxu0 %v804_v27  ;;  %768 = vmatmul.mubr.bf16.gmra.mrb[4].mxu1 %v805_v28 }
  0x85   :  { %v355_v33 = vpop.permute.xlu0 %354  ;;  %v365_v34 = vpop.permute.xlu1 %364 }
  0x89   :  { %v360_v35 = vpop.permute.xlu0 %359  ;;  %v370_v36 = vpop.permute.xlu1 %369 }
  0x8d   :  { %v938_v37 = vpop.permute.xlu0 %374  ;;  %v940_v38 = vpop.permute.xlu1 %379 }
  0x91   :  { %v942_v39 = vpop.permute.xlu0 %384  ;;  %v944_v40 = vpop.permute.xlu1 %389 }
  0x95   :  { %v395_v41 = vpop.permute.xlu0 %394  ;;  %v400_v42 = vpop.permute.xlu1 %399 }
  0x99   :  { %v405_v43 = vpop.permute.xlu0 %404  ;;  %v410_v44 = vpop.permute.xlu1 %409 }
  0x9d   :  { %v946_v45 = vpop.permute.xlu0 %414  ;;  %v982_v20 = vpop.permute.xlu1 %419 }
  0xa3   :  { %v425_v21 = vpop.permute.xlu0 %424 }
  0xf5   :  { %v757_v46 = vpop.f32.mrb[0].mxu0  ;;  %v765_v48 = vpop.f32.mrb[0].mxu1 }
  0xf6   :  { %v434_v50 = vmul.f32 %v757_v46, %v365_v34  ;;  %v442_v51 = vmul.f32 %v765_v48, %v405_v43  ;;  %v222_v52 = vpop.f32.mrb[1].mxu0  ;;  %v254_v54 = vpop.f32.mrb[1].mxu1  ;;  %v462_v48 = vld [vmem:[%s1073_s2 + $0x70] sm:$0xff] }
  0xf7   :  { %v432_v56 = vmul.f32 %v355_v33, %v222_v52  ;;  %v440_v57 = vmul.f32 %v395_v41, %v254_v54  ;;  %v758_v58 = vpop.f32.mrb[2].mxu0  ;;  %v766_v60 = vpop.f32.mrb[2].mxu1 }
  0xf8   :  { %v466_v62 = vadd.f32 %v450_v47, %v434_v50  ;;  %v474_v63 = vadd.f32 %v458_v49, %v442_v51  ;;  %v435_v0 = vmul.f32 %v758_v58, %v370_v36  ;;  %v443_v1 = vmul.f32 %v766_v60, %v410_v44  ;;  %v225_v2 = vpop.f32.mrb[3].mxu0  ;;  %v257_v4 = vpop.f32.mrb[3].mxu1  ;;  %v454_v47 = vld [vmem:[%s1073_s2 + $0x30] sm:$0xff] }
  0xf9   :  { %v464_v7 = vadd.f32 %v448_v53, %v432_v56  ;;  %v472_v8 = vadd.f32 %v456_v55, %v440_v57  ;;  %v433_v9 = vmul.f32 %v360_v35, %v225_v2  ;;  %v441_v10 = vmul.f32 %v400_v42, %v257_v4  ;;  %v452_v55 = vld [vmem:[%s1073_s2 + $0x20] sm:$0xff]  ;;  %v430_v2 = vpop.permute.xlu1 %429 }
  0xfa   :  { %v482_v11 = vmax.f32 %v466_v62, 0.0  ;;  %v490_v12 = vmax.f32 %v474_v63, 0.0  ;;  %v467_v13 = vadd.f32 %v451_v59, %v435_v0  ;;  %v475_v14 = vadd.f32 %v459_v61, %v443_v1  ;;  %v460_v56 = vld [vmem:[%s1073_s2 + $0x60] sm:$0xff] }
  0xfb   :  { %v480_v16 = vmax.f32 %v464_v7, 0.0  ;;  %v488_v17 = vmax.f32 %v472_v8, 0.0  ;;  %v465_v18 = vadd.f32 %v449_v3, %v433_v9  ;;  %v473_v19 = vadd.f32 %v457_v5, %v441_v10  ;;  %v455_v8 = vld [vmem:[%s1073_s2 + $0x38] sm:$0xff] }
  0xfc   :  { %v505_v22 = vmul.f32 %v975_v6, %v482_v11  ;;  %v513_v23 = vmul.f32 %v975_v6, %v490_v12  ;;  %v483_v24 = vmax.f32 %v467_v13, 0.0  ;;  %v491_v25 = vmax.f32 %v475_v14, 0.0  ;;  %v463_v9 = vld [vmem:[%s1073_s2 + $0x78] sm:$0xff]  ;;  %v453_v12 = vld [vmem:[%s1073_s2 + $0x28] sm:$0xff] }
  0xfd   :  { %v503_v26 = vmul.f32 %v975_v6, %v480_v16  ;;  %v511_v27 = vmul.f32 %v975_v6, %v488_v17  ;;  %v481_v28 = vmax.f32 %v465_v18, 0.0  ;;  %v489_v29 = vmax.f32 %v473_v19, 0.0  ;;  %v761_v30 = vpop.f32.mrb[4].mxu0  ;;  %v769_v31 = vpop.f32.mrb[4].mxu1  ;;  %v461_v13 = vld [vmem:[%s1073_s2 + $0x68] sm:$0xff] }
  0xfe   :  { %v528_v32 = vadd.f32 %v980_v15, %v505_v22  ;;  %v536_v33 = vadd.f32 %v980_v15, %v513_v23  ;;  %v506_v34 = vmul.f32 %v975_v6, %v483_v24  ;;  %v514_v35 = vmul.f32 %v975_v6, %v491_v25  ;;  %v238_v36 = vpop.f32.mrb[5].mxu0  ;;  %v270_v41 = vpop.f32.mrb[5].mxu1 }
  0xff   :  { %v526_v42 = vadd.f32 %v980_v15, %v503_v26  ;;  %v534_v43 = vadd.f32 %v980_v15, %v511_v27  ;;  %v504_v44 = vmul.f32 %v975_v6, %v481_v28  ;;  %v512_v46 = vmul.f32 %v975_v6, %v489_v29  ;;  %v762_v49 = vpop.f32.mrb[6].mxu0  ;;  %v770_v50 = vpop.f32.mrb[6].mxu1 }
 0x100   :  { %v529_v51 = vadd.f32 %v980_v15, %v506_v34  ;;  %v537_v52 = vadd.f32 %v980_v15, %v514_v35  ;;  %v438_v53 = vmul.f32 %v761_v30, %v942_v39  ;;  %v446_v54 = vmul.f32 %v769_v31, %v425_v21  ;;  %v241_v57 = vpop.f32.mrb[7].mxu0  ;;  %v273_v58 = vpop.f32.mrb[7].mxu1 }
 0x101   :  { %v527_v59 = vadd.f32 %v980_v15, %v504_v44  ;;  %v535_v60 = vadd.f32 %v980_v15, %v512_v46  ;;  %v436_v61 = vmul.f32 %v938_v37, %v238_v36  ;;  %v444_v62 = vmul.f32 %v946_v45, %v270_v41 }
 0x102   :  { %v684_v39 = vpack.c.bf16 %v529_v51, %v528_v32  ;;  %v704_v63 = vpack.c.bf16 %v537_v52, %v536_v33  ;;  %v470_v0 = vadd.f32 %v454_v47, %v438_v53  ;;  %v478_v1 = vadd.f32 %v462_v48, %v446_v54 }
 0x103   :  { %v679_v3 = vpack.c.bf16 %v527_v59, %v526_v42  ;;  %v699_v4 = vpack.c.bf16 %v535_v60, %v534_v43  ;;  %v468_v5 = vadd.f32 %v452_v55, %v436_v61  ;;  %v476_v7 = vadd.f32 %v460_v56, %v444_v62 }
 0x104   :  { %716 = vst [vmem:[%s1076_s6 + $0x8] sm:$0xff] %v684_v39   ;;  %720 = vst [vmem:[%s1076_s6 + $0x28] sm:$0xff] %v704_v63   ;;  %v486_v37 = vmax.f32 %v470_v0, 0.0  ;;  %v494_v45 = vmax.f32 %v478_v1, 0.0  ;;  %v439_v10 = vmul.f32 %v762_v49, %v944_v40  ;;  %v447_v11 = vmul.f32 %v770_v50, %v430_v2 }
 0x105   :  { %680 = vst [vmem:[%s1076_s6] sm:$0xff] %v679_v3   ;;  %719 = vst [vmem:[%s1076_s6 + $0x20] sm:$0xff] %v699_v4   ;;  %v484_v14 = vmax.f32 %v468_v5, 0.0  ;;  %v492_v16 = vmax.f32 %v476_v7, 0.0  ;;  %v437_v40 = vmul.f32 %v940_v38, %v241_v57  ;;  %v445_v17 = vmul.f32 %v982_v20, %v273_v58 }
 0x106   :  { %v471_v18 = vadd.f32 %v455_v8, %v439_v10  ;;  %v479_v19 = vadd.f32 %v463_v9, %v447_v11  ;;  %v509_v23 = vmul.f32 %v975_v6, %v486_v37  ;;  %v517_v24 = vmul.f32 %v975_v6, %v494_v45 }
 0x107   :  { %v469_v21 = vadd.f32 %v453_v12, %v437_v40  ;;  %v477_v22 = vadd.f32 %v461_v13, %v445_v17  ;;  %v507_v27 = vmul.f32 %v975_v6, %v484_v14  ;;  %v515_v28 = vmul.f32 %v975_v6, %v492_v16 }
 0x108   :  { %v487_v25 = vmax.f32 %v471_v18, 0.0  ;;  %v495_v26 = vmax.f32 %v479_v19, 0.0  ;;  %v532_v33 = vadd.f32 %v980_v15, %v509_v23  ;;  %v540_v34 = vadd.f32 %v980_v15, %v517_v24 }
 0x109   :  { %v485_v29 = vmax.f32 %v469_v21, 0.0  ;;  %v493_v30 = vmax.f32 %v477_v22, 0.0  ;;  %v530_v41 = vadd.f32 %v980_v15, %v507_v27  ;;  %v538_v42 = vadd.f32 %v980_v15, %v515_v28 }
 0x10a   :  { %v510_v38 = vmul.f32 %v975_v6, %v487_v25  ;;  %v518_v20 = vmul.f32 %v975_v6, %v495_v26 }
 0x10b   :  { %v508_v31 = vmul.f32 %v975_v6, %v485_v29  ;;  %v516_v32 = vmul.f32 %v975_v6, %v493_v30 }
 0x10c   :  { %v533_v35 = vadd.f32 %v980_v15, %v510_v38  ;;  %v541_v36 = vadd.f32 %v980_v15, %v518_v20 }
 0x10d   :  { %v531_v43 = vadd.f32 %v980_v15, %v508_v31  ;;  %v539_v44 = vadd.f32 %v980_v15, %v516_v32 }
 0x10e   :  { %v694_v46 = vpack.c.bf16 %v533_v35, %v532_v33  ;;  %v714_v47 = vpack.c.bf16 %v541_v36, %v540_v34 }
 0x10f   :  { %v689_v48 = vpack.c.bf16 %v531_v43, %v530_v41  ;;  %v709_v6 = vpack.c.bf16 %v539_v44, %v538_v42 }
 0x110   :  { %718 = vst [vmem:[%s1076_s6 + $0x18] sm:$0xff] %v694_v46   ;;  %722 = vst [vmem:[%s1076_s6 + $0x38] sm:$0xff] %v714_v47  }
 0x111   :  { %717 = vst [vmem:[%s1076_s6 + $0x10] sm:$0xff] %v689_v48   ;;  %721 = vst [vmem:[%s1076_s6 + $0x30] sm:$0xff] %v709_v6  }

// kernel: sage_forward.11
= control target key start
LH: loop header
LB: loop body
LE: loop exit
PB: predicated region body
PF: predicated region fallthrough
CT: control target
= control target key end

     0   :  { %v1142_v2 = vmov 0   ;;  %s1458_s0 = inlined_call_operand.vmem [shape: bf16[128,128], index: 0, kind: input, shape index: {}]   ;;  %s1459_s1 = inlined_call_operand.vmem [shape: bf16[128,128], index: 1, kind: input, shape index: {}]   ;;  %s1460_s2 = inlined_call_operand.vmem [shape: f32[128,128], index: 2, kind: input, shape index: {}]   ;;  %s1461_s3 = inlined_call_operand.vmem [shape: f32[128,1], index: 3, kind: input, shape index: {}]   ;;  %s1462_s4 = inlined_call_operand.vmem [shape: f32[1,128], index: 4, kind: input, shape index: {}]   ;;  %s1463_s5 = inlined_call_operand.vmem [shape: f32[1,128], index: 5, kind: input, shape index: {}]   ;;  %s1464_s6 = inlined_call_operand.vmem [shape: f32[128,128], index: 6, kind: input, shape index: {}]   ;;  %s1465_s7 = inlined_call_operand.vmem [shape: f32[1,128], index: 7, kind: input, shape index: {}]   ;;  %s1466_s8 = inlined_call_operand.hbm [shape: f32[128,128], index: 8, kind: output, shape index: {}]  }
   0x1   :  { %v1038_v0 = vld [vmem:[%s1459_s1] sm:$0xff]   ;;  %v1039_v1 = vld [vmem:[%s1459_s1 + $0x8] sm:$0xff]   ;;  %1036 = vset.pattern.permute.xlu0 %v1142_v2  ;;  %1037 = vset.pattern.permute.xlu1 %v1142_v2  ;;  %v1040_v3 = vld [vmem:[%s1459_s1 + $0x10] sm:$0xff]  }
   0x2   :  { %912 = vmatprep.subr.bf16.mxu0 %v1038_v0  ;;  %v1041_v4 = vld [vmem:[%s1459_s1 + $0x18] sm:$0xff]   ;;  %v1046_v5 = vld [vmem:[%s1458_s0] sm:$0xff]   ;;  %v1043_v7 = vld [vmem:[%s1459_s1 + $0x28] sm:$0xff]  }
   0x3   :  { %913 = vmatpush3.bf16.msra.mxu0 %v1038_v0  ;;  %928 = vmatprep.mubr.bf16.mxu0 %v1046_v5  ;;  %v1042_v6 = vld [vmem:[%s1459_s1 + $0x20] sm:$0xff]   ;;  %v345_v9 = vld [vmem:[%s1461_s3 + $0x10] sm:$0xff]  ;;  %v344_v10 = vld [vmem:[%s1461_s3 + $0x8] sm:$0xff] }
   0x4   :  { %914 = vmatprep.subr.bf16.mxu0 %v1039_v1  ;;  %v343_v8 = vld [vmem:[%s1461_s3] sm:$0xff]  ;;  %371 = vperm.xlu1 %1037, %v345_v9   ;;  %v346_v11 = vld [vmem:[%s1461_s3 + $0x18] sm:$0xff]  ;;  %v1044_v12 = vld [vmem:[%s1459_s1 + $0x30] sm:$0xff]  }
   0x5   :  { %361 = vperm.xlu0 %1036, %v343_v8  }
   0x7   :  { %915 = vmatpush3.bf16.msra.mxu0 %v1039_v1 }
   0x8   :  { %916 = vmatprep.subr.bf16.mxu0 %v1040_v3  ;;  %376 = vperm.xlu1 %1037, %v346_v11  }
   0x9   :  { %366 = vperm.xlu0 %1036, %v344_v10  }
   0xb   :  { %917 = vmatpush3.bf16.msra.mxu0 %v1040_v3 }
   0xc   :  { %918 = vmatprep.subr.bf16.mxu0 %v1041_v4 }
   0xf   :  { %919 = vmatpush3.bf16.msra.mxu0 %v1041_v4 }
  0x10   :  { %920 = vmatprep.subr.bf16.mxu0 %v1042_v6 }
  0x13   :  { %921 = vmatpush3.bf16.msra.mxu0 %v1042_v6 }
  0x14   :  { %922 = vmatprep.subr.bf16.mxu0 %v1043_v7 }
  0x15   :  { %13 = vsyncpa [#allocation4], 0  ;;  %v347_v13 = vld [vmem:[%s1461_s3 + $0x20] sm:$0xff]  ;;  %v348_v14 = vld [vmem:[%s1461_s3 + $0x28] sm:$0xff] }
  0x16   :  { %v1045_v15 = vld [vmem:[%s1459_s1 + $0x38] sm:$0xff]   ;;  %v533_v16 = vld [vmem:[%s1464_s6] sm:$0xff]  ;;  %v534_v17 = vld [vmem:[%s1464_s6 + $0x8] sm:$0xff]  ;;  %381 = vperm.xlu0 %1036, %v347_v13   ;;  %386 = vperm.xlu1 %1037, %v348_v14  }
  0x17   :  { %923 = vmatpush3.bf16.msra.mxu0 %v1043_v7  ;;  %v1000_v18 = vpack.c.bf16 %v534_v17, %v533_v16  ;;  %v349_v19 = vld [vmem:[%s1461_s3 + $0x30] sm:$0xff]  ;;  %v350_v20 = vld [vmem:[%s1461_s3 + $0x38] sm:$0xff]  ;;  %v1047_v24 = vld [vmem:[%s1458_s0 + $0x8] sm:$0xff]  }
  0x18   :  { %924 = vmatprep.subr.bf16.mxu0 %v1044_v12  ;;  %v535_v21 = vld [vmem:[%s1464_s6 + $0x10] sm:$0xff]  ;;  %v536_v22 = vld [vmem:[%s1464_s6 + $0x18] sm:$0xff]  ;;  %v351_v25 = vld [vmem:[%s1461_s3 + $0x40] sm:$0xff] }
  0x19   :  { %1001 = vmatprep.subr.bf16.mxu1 %v1000_v18  ;;  %v1004_v23 = vpack.c.bf16 %v536_v22, %v535_v21  ;;  %v352_v26 = vld [vmem:[%s1461_s3 + $0x48] sm:$0xff]  ;;  %v1048_v27 = vld [vmem:[%s1458_s0 + $0x10] sm:$0xff]   ;;  %v537_v28 = vld [vmem:[%s1464_s6 + $0x20] sm:$0xff] }
  0x1a   :  { %1003 = vmatpush3.bf16.msra.mxu1 %v1000_v18  ;;  %391 = vperm.xlu0 %1036, %v349_v19   ;;  %v538_v29 = vld [vmem:[%s1464_s6 + $0x28] sm:$0xff]  ;;  %v353_v31 = vld [vmem:[%s1461_s3 + $0x50] sm:$0xff]  ;;  %v354_v32 = vld [vmem:[%s1461_s3 + $0x58] sm:$0xff] }
  0x1b   :  { %925 = vmatpush3.bf16.msra.mxu0 %v1044_v12  ;;  %396 = vperm.xlu1 %1037, %v350_v20   ;;  %v1008_v30 = vpack.c.bf16 %v538_v29, %v537_v28  ;;  %v539_v33 = vld [vmem:[%s1464_s6 + $0x30] sm:$0xff]  ;;  %v540_v34 = vld [vmem:[%s1464_s6 + $0x38] sm:$0xff]  ;;  %v355_v37 = vld [vmem:[%s1461_s3 + $0x60] sm:$0xff] }
  0x1c   :  { %926 = vmatprep.subr.bf16.mxu0 %v1045_v15  ;;  %1005 = vmatprep.subr.bf16.mxu1 %v1004_v23  ;;  %v1012_v35 = vpack.c.bf16 %v540_v34, %v539_v33  ;;  %v1049_v36 = vld [vmem:[%s1458_s0 + $0x18] sm:$0xff]   ;;  %v356_v38 = vld [vmem:[%s1461_s3 + $0x68] sm:$0xff]  ;;  %v1050_v39 = vld [vmem:[%s1458_s0 + $0x20] sm:$0xff]  }
  0x1d   :  { %v541_v40 = vld [vmem:[%s1464_s6 + $0x40] sm:$0xff]  ;;  %v542_v41 = vld [vmem:[%s1464_s6 + $0x48] sm:$0xff]  ;;  %v357_v43 = vld [vmem:[%s1461_s3 + $0x70] sm:$0xff] }
  0x1e   :  { %1007 = vmatpush3.bf16.msra.mxu1 %v1004_v23  ;;  %401 = vperm.xlu0 %1036, %v351_v25   ;;  %v1016_v42 = vpack.c.bf16 %v542_v41, %v541_v40  ;;  %v358_v44 = vld [vmem:[%s1461_s3 + $0x78] sm:$0xff]  ;;  %v1051_v45 = vld [vmem:[%s1458_s0 + $0x28] sm:$0xff]   ;;  %v1052_v46 = vld [vmem:[%s1458_s0 + $0x30] sm:$0xff]  }
  0x1f   :  { %927 = vmatpush3.bf16.msra.mxu0 %v1045_v15  ;;  %406 = vperm.xlu1 %1037, %v352_v26   ;;  %v1053_v47 = vld [vmem:[%s1458_s0 + $0x38] sm:$0xff]   ;;  %v543_v48 = vld [vmem:[%s1464_s6 + $0x50] sm:$0xff]  ;;  %v545_v51 = vld [vmem:[%s1464_s6 + $0x60] sm:$0xff] }
  0x20   :  { %1009 = vmatprep.subr.bf16.mxu1 %v1008_v30  ;;  %v544_v49 = vld [vmem:[%s1464_s6 + $0x58] sm:$0xff]  ;;  %v546_v52 = vld [vmem:[%s1464_s6 + $0x68] sm:$0xff]  ;;  %v547_v54 = vld [vmem:[%s1464_s6 + $0x70] sm:$0xff] }
  0x21   :  { %v1020_v50 = vpack.c.bf16 %v544_v49, %v543_v48  ;;  %v1024_v53 = vpack.c.bf16 %v546_v52, %v545_v51  ;;  %v548_v55 = vld [vmem:[%s1464_s6 + $0x78] sm:$0xff]  ;;  %v457_v1 = vld [vmem:[%s1460_s2 + $0x10] sm:$0xff]  ;;  %v455_v4 = vld [vmem:[%s1460_s2] sm:$0xff] }
  0x22   :  { %929 = vmatmul.mubr.bf16.vlgmr.msra.gmra.mrb[0].mxu0 %v1047_v24  ;;  %1011 = vmatpush3.bf16.msra.mxu1 %v1008_v30  ;;  %v1028_v56 = vpack.c.bf16 %v548_v55, %v547_v54  ;;  %v1344_v9 = vld [vmem:[%s1462_s4] ss:$0 sm:$0xff]  ;;  %v458_v11 = vld [vmem:[%s1460_s2 + $0x18] sm:$0xff]  ;;  %v456_v13 = vld [vmem:[%s1460_s2 + $0x8] sm:$0xff] }
  0x23   :  { %932 = vmatprep.mubr.bf16.mxu0 %v1048_v27  ;;  %411 = vperm.xlu0 %1036, %v353_v31   ;;  %v1355_v16 = vld [vmem:[%s1463_s5] ss:$0 sm:$0xff]  ;;  %v461_v25 = vld [vmem:[%s1460_s2 + $0x30] sm:$0xff] }
  0x24   :  { %416 = vperm.xlu1 %1037, %v354_v32   ;;  %1013 = vmatprep.subr.bf16.mxu1 %v1012_v35  ;;  %v459_v29 = vld [vmem:[%s1460_s2 + $0x20] sm:$0xff]  ;;  %v465_v51 = vld [vmem:[%s1460_s2 + $0x50] sm:$0xff] }
  0x25   :  { %v463_v55 = vld [vmem:[%s1460_s2 + $0x40] sm:$0xff] }
  0x26   :  { %1015 = vmatpush3.bf16.msra.mxu1 %v1012_v35 }
  0x27   :  { %421 = vperm.xlu0 %1036, %v355_v37   ;;  %1017 = vmatprep.subr.bf16.mxu1 %v1016_v42 }
  0x28   :  { %426 = vperm.xlu1 %1037, %v356_v38   ;;  %v460_v38 = vld [vmem:[%s1460_s2 + $0x28] sm:$0xff] }
  0x2a   :  { %933 = vmatmul.mubr.bf16.gmra.mrb[4].mxu0 %v1049_v36  ;;  %1019 = vmatpush3.bf16.msra.mxu1 %v1016_v42  ;;  %v462_v36 = vld [vmem:[%s1460_s2 + $0x38] sm:$0xff] }
  0x2b   :  { %936 = vmatprep.mubr.bf16.mxu0 %v1050_v39  ;;  %431 = vperm.xlu0 %1036, %v357_v43  }
  0x2c   :  { %436 = vperm.xlu1 %1037, %v358_v44   ;;  %1021 = vmatprep.subr.bf16.mxu1 %v1020_v50 }
  0x2e   :  { %1023 = vmatpush3.bf16.msra.mxu1 %v1020_v50 }
  0x2f   :  { %1025 = vmatprep.subr.bf16.mxu1 %v1024_v53 }
  0x32   :  { %937 = vmatmul.mubr.bf16.gmra.mrb[8].mxu0 %v1051_v45  ;;  %1027 = vmatpush3.bf16.msra.mxu1 %v1024_v53 }
  0x33   :  { %940 = vmatprep.mubr.bf16.mxu0 %v1052_v46  ;;  %1029 = vmatprep.subr.bf16.mxu1 %v1028_v56 }
  0x36   :  { %1031 = vmatpush3.bf16.msra.mxu1 %v1028_v56 }
  0x3a   :  { %941 = vmatmul.mubr.bf16.gmra.mrb[12].mxu0 %v1053_v47 }
  0x83   :  { %v372_v58 = vpop.permute.xlu1 %371 }
  0x84   :  { %v362_v57 = vpop.permute.xlu0 %361 }
  0x87   :  { %v377_v60 = vpop.permute.xlu1 %376 }
  0x88   :  { %v367_v59 = vpop.permute.xlu0 %366 }
  0x95   :  { %v382_v61 = vpop.permute.xlu0 %381  ;;  %v387_v62 = vpop.permute.xlu1 %386 }
  0x99   :  { %v392_v63 = vpop.permute.xlu0 %391 }
  0x9a   :  { %v397_v5 = vpop.permute.xlu1 %396 }
  0x9d   :  { %v402_v17 = vpop.permute.xlu0 %401 }
  0x9e   :  { %v407_v22 = vpop.permute.xlu1 %406 }
  0xa2   :  { %v412_v40 = vpop.permute.xlu0 %411 }
  0xa3   :  { %v417_v43 = vpop.permute.xlu1 %416 }
  0xa6   :  { %v422_v56 = vpop.permute.xlu0 %421 }
  0xf5   :  { %v930_v0 = vpop.f32.mrb[0].mxu0 }
  0xf6   :  { %v441_v2 = vmul.f32 %v930_v0, %v372_v58  ;;  %v229_v3 = vpop.f32.mrb[1].mxu0 }
  0xf7   :  { %v439_v6 = vmul.f32 %v362_v57, %v229_v3  ;;  %v931_v7 = vpop.f32.mrb[2].mxu0  ;;  %v427_v3 = vpop.permute.xlu1 %426 }
  0xf8   :  { %v473_v8 = vadd.f32 %v457_v1, %v441_v2  ;;  %v442_v10 = vmul.f32 %v931_v7, %v377_v60  ;;  %v232_v12 = vpop.f32.mrb[3].mxu0  ;;  %v464_v1 = vld [vmem:[%s1460_s2 + $0x48] sm:$0xff] }
  0xf9   :  { %v471_v14 = vadd.f32 %v455_v4, %v439_v6  ;;  %v440_v15 = vmul.f32 %v367_v59, %v232_v12  ;;  %v432_v12 = vpop.permute.xlu0 %431 }
  0xfa   :  { %v474_v18 = vadd.f32 %v458_v11, %v442_v10  ;;  %v496_v21 = vmul.f32 %v1344_v9, %v473_v8 }
  0xfb   :  { %v472_v19 = vadd.f32 %v456_v13, %v440_v15  ;;  %v494_v20 = vmul.f32 %v1344_v9, %v471_v14  ;;  %v469_v15 = vld [vmem:[%s1460_s2 + $0x70] sm:$0xff] }
  0xfc   :  { %v497_v30 = vmul.f32 %v1344_v9, %v474_v18  ;;  %v519_v39 = vadd.f32 %v1355_v16, %v496_v21  ;;  %v437_v21 = vpop.permute.xlu1 %436 }
  0xfd   :  { %v495_v23 = vmul.f32 %v1344_v9, %v472_v19  ;;  %v934_v24 = vpop.f32.mrb[4].mxu0  ;;  %v517_v26 = vadd.f32 %v1355_v16, %v494_v20  ;;  %v467_v20 = vld [vmem:[%s1460_s2 + $0x60] sm:$0xff] }
  0xfe   :  { %v445_v27 = vmul.f32 %v934_v24, %v392_v63  ;;  %v245_v28 = vpop.f32.mrb[5].mxu0  ;;  %v520_v47 = vadd.f32 %v1355_v16, %v497_v30  ;;  %v466_v63 = vld [vmem:[%s1460_s2 + $0x58] sm:$0xff]  ;;  %v468_v30 = vld [vmem:[%s1460_s2 + $0x68] sm:$0xff] }
  0xff   :  { %v443_v31 = vmul.f32 %v382_v61, %v245_v28  ;;  %v935_v32 = vpop.f32.mrb[6].mxu0  ;;  %976 = vmatprep.mubr.f32.mxu1 %v517_v26  ;;  %v518_v33 = vadd.f32 %v1355_v16, %v495_v23  ;;  %v470_v28 = vld [vmem:[%s1460_s2 + $0x78] sm:$0xff] }
 0x100   :  { %v477_v34 = vadd.f32 %v461_v25, %v445_v27  ;;  %v446_v35 = vmul.f32 %v935_v32, %v397_v5  ;;  %v248_v37 = vpop.f32.mrb[7].mxu0 }
 0x101   :  { %v475_v41 = vadd.f32 %v459_v29, %v443_v31  ;;  %v444_v42 = vmul.f32 %v387_v62, %v248_v37  ;;  %977 = vmatmul.mubr.f32.vlgmr.msra.gmra.mrb[0].mxu1 %v518_v33 }
 0x102   :  { %979 = vmatprep.mubr.f32.mxu1 %v519_v39  ;;  %v478_v45 = vadd.f32 %v462_v36, %v446_v35  ;;  %v500_v48 = vmul.f32 %v1344_v9, %v477_v34 }
 0x103   :  { %v498_v44 = vmul.f32 %v1344_v9, %v475_v41  ;;  %v476_v46 = vadd.f32 %v460_v38, %v444_v42 }
 0x104   :  { %v501_v57 = vmul.f32 %v1344_v9, %v478_v45  ;;  %v523_v2 = vadd.f32 %v1355_v16, %v500_v48  ;;  %v1428_v45 = vld [vmem:[%s1465_s7] ss:$0 sm:$0xff]  ;;  %s1143_s7 = smov [#allocation3]  }
 0x105   :  { %v499_v49 = vmul.f32 %v1344_v9, %v476_v46  ;;  %v938_v50 = vpop.f32.mrb[8].mxu0  ;;  %980 = vmatmul.mubr.f32.gmra.mrb[2].mxu1 %v520_v47  ;;  %v521_v52 = vadd.f32 %v1355_v16, %v498_v44  ;;  %s818_s16 = sshll.u32 %s1143_s7, 4  ;;  %s819_s16 = int_to_ptr.vmem [resolvable:$true] %s818_s16 }
 0x106   :  { %v449_v53 = vmul.f32 %v938_v50, %v412_v40  ;;  %v261_v54 = vpop.f32.mrb[9].mxu0  ;;  %v524_v10 = vadd.f32 %v1355_v16, %v501_v57  ;;  %s1118_s17 = scalar_lea.vmem %s819_s16, 2048  ;;  %p1123_p1 = scmp.lt.s32.totalorder %s819_s16, %s819_s16 }
 0x107   :  { %v447_v58 = vmul.f32 %v402_v17, %v261_v54  ;;  %v939_v59 = vpop.f32.mrb[10].mxu0  ;;  %982 = vmatprep.mubr.f32.mxu1 %v521_v52  ;;  %v522_v60 = vadd.f32 %v1355_v16, %v499_v49  ;;  %p1119_p0 = scmp.ne.s32.totalorder %s819_s16, %s1118_s17  ;;  %p1124_p2 = scmp.lt.s32.totalorder %s1118_s17, %s1118_s17 }
 0x108   :  { %v481_v61 = vadd.f32 %v465_v51, %v449_v53  ;;  %v450_v62 = vmul.f32 %v939_v59, %v417_v43  ;;  %v264_v0 = vpop.f32.mrb[11].mxu0 }
 0x109   :  { %v479_v4 = vadd.f32 %v463_v55, %v447_v58  ;;  %v448_v5 = vmul.f32 %v407_v22, %v264_v0  ;;  %983 = vmatmul.mubr.f32.gmra.mrb[4].mxu1 %v522_v60  ;;  %p1125_p3 = por %p1124_p2, %p1123_p1 }
 0x10a   :  { %985 = vmatprep.mubr.f32.mxu1 %v523_v2  ;;  %v482_v7 = vadd.f32 %v466_v63, %v450_v62  ;;  %v504_v11 = vmul.f32 %v1344_v9, %v481_v61 }
 0x10b   :  { %v502_v6 = vmul.f32 %v1344_v9, %v479_v4  ;;  %v480_v8 = vadd.f32 %v464_v1, %v448_v5  ;;  %p1126_p4 = pnand %p1125_p3, %p1119_p0 }
 0x10c   :  { %v505_v22 = vmul.f32 %v1344_v9, %v482_v7  ;;  %v527_v31 = vadd.f32 %v1355_v16, %v504_v11 }
 0x10d   :  { %v503_v13 = vmul.f32 %v1344_v9, %v480_v8  ;;  %v942_v14 = vpop.f32.mrb[12].mxu0  ;;  %986 = vmatmul.mubr.f32.gmra.mrb[6].mxu1 %v524_v10  ;;  %v525_v17 = vadd.f32 %v1355_v16, %v502_v6 }
 0x10e   :  { %v453_v18 = vmul.f32 %v942_v14, %v432_v12  ;;  %v277_v19 = vpop.f32.mrb[13].mxu0  ;;  %v528_v37 = vadd.f32 %v1355_v16, %v505_v22 }
 0x10f   :  { %v451_v23 = vmul.f32 %v422_v56, %v277_v19  ;;  %v943_v24 = vpop.f32.mrb[14].mxu0  ;;  %988 = vmatprep.mubr.f32.mxu1 %v525_v17  ;;  %v526_v25 = vadd.f32 %v1355_v16, %v503_v13 }
 0x110   :  { %v485_v26 = vadd.f32 %v469_v15, %v453_v18  ;;  %v454_v27 = vmul.f32 %v943_v24, %v437_v21  ;;  %v280_v29 = vpop.f32.mrb[15].mxu0 }
 0x111   :  { %v483_v32 = vadd.f32 %v467_v20, %v451_v23  ;;  %v452_v33 = vmul.f32 %v427_v3, %v280_v29  ;;  %989 = vmatmul.mubr.f32.gmra.mrb[8].mxu1 %v526_v25 }
 0x112   :  { %991 = vmatprep.mubr.f32.mxu1 %v527_v31  ;;  %v486_v35 = vadd.f32 %v470_v28, %v454_v27  ;;  %v508_v38 = vmul.f32 %v1344_v9, %v485_v26 }
 0x113   :  { %v506_v34 = vmul.f32 %v1344_v9, %v483_v32  ;;  %v484_v36 = vadd.f32 %v468_v30, %v452_v33 }
 0x114   :  { %v509_v41 = vmul.f32 %v1344_v9, %v486_v35  ;;  %v531_v43 = vadd.f32 %v1355_v16, %v508_v38 }
 0x115   :  { %v507_v39 = vmul.f32 %v1344_v9, %v484_v36  ;;  %992 = vmatmul.mubr.f32.gmra.mrb[10].mxu1 %v528_v37  ;;  %v529_v40 = vadd.f32 %v1355_v16, %v506_v34 }
 0x116   :  { %v532_v44 = vadd.f32 %v1355_v16, %v509_v41 }
 0x117   :  { %994 = vmatprep.mubr.f32.mxu1 %v529_v40  ;;  %v530_v42 = vadd.f32 %v1355_v16, %v507_v39 }
 0x119   :  { %995 = vmatmul.mubr.f32.gmra.mrb[12].mxu1 %v530_v42 }
 0x11a   :  { %997 = vmatprep.mubr.f32.mxu1 %v531_v43 }
 0x11d   :  { %998 = vmatmul.mubr.f32.gmra.mrb[14].mxu1 %v532_v44 }
 0x1d4   :  { %v978_v46 = vpop.f32.mrb[0].mxu1 }
 0x1d5   :  { %v628_v47 = vadd.f32 %v978_v46, %v1428_v45  ;;  %v622_v48 = vpop.f32.mrb[1].mxu1 }
 0x1d6   :  { %v623_v9 = vadd.f32 %v1428_v45, %v622_v48 }
 0x1d7   :  { %v849_v49 = vmul.f32 -1.442695, %v628_v47 }
 0x1d8   :  { %v848_v50 = vmul.f32 -1.442695, %v623_v9  ;;  %v981_v51 = vpop.f32.mrb[2].mxu1 }
 0x1d9   :  { %1054 = vpow2.f32 %v849_v49  ;;  %v638_v52 = vadd.f32 %v981_v51, %v1428_v45  ;;  %v632_v53 = vpop.f32.mrb[3].mxu1 }
 0x1da   :  { %1056 = vpow2.f32 %v848_v50  ;;  %v633_v16 = vadd.f32 %v1428_v45, %v632_v53 }
 0x1db   :  { %v851_v54 = vmul.f32 -1.442695, %v638_v52 }
 0x1dc   :  { %v850_v55 = vmul.f32 -1.442695, %v633_v16  ;;  %v984_v56 = vpop.f32.mrb[4].mxu1 }
 0x1dd   :  { %1058 = vpow2.f32 %v851_v54  ;;  %v648_v57 = vadd.f32 %v984_v56, %v1428_v45  ;;  %v642_v58 = vpop.f32.mrb[5].mxu1 }
 0x1de   :  { %1060 = vpow2.f32 %v850_v55  ;;  %v643_v59 = vadd.f32 %v1428_v45, %v642_v58 }
 0x1df   :  { %v853_v60 = vmul.f32 -1.442695, %v648_v57 }
 0x1e0   :  { %v852_v61 = vmul.f32 -1.442695, %v643_v59  ;;  %v987_v62 = vpop.f32.mrb[6].mxu1 }
 0x1e1   :  { %1062 = vpow2.f32 %v853_v60  ;;  %v658_v63 = vadd.f32 %v987_v62, %v1428_v45  ;;  %v652_v0 = vpop.f32.mrb[7].mxu1 }
 0x1e2   :  { %1064 = vpow2.f32 %v852_v61  ;;  %v653_v1 = vadd.f32 %v1428_v45, %v652_v0 }
 0x1e3   :  { %v1055_v2 = vpop.eup %1054  ;;  %v855_v3 = vmul.f32 -1.442695, %v658_v63 }
 0x1e4   :  { %v1057_v4 = vpop.eup %1056  ;;  %v750_v5 = vadd.f32 1.0, %v1055_v2  ;;  %v854_v6 = vmul.f32 -1.442695, %v653_v1  ;;  %v990_v7 = vpop.f32.mrb[8].mxu1 }
 0x1e5   :  { %v749_v8 = vadd.f32 1.0, %v1057_v4  ;;  %1066 = vpow2.f32 %v855_v3  ;;  %v668_v10 = vadd.f32 %v990_v7, %v1428_v45  ;;  %v662_v11 = vpop.f32.mrb[9].mxu1 }
 0x1e6   :  { %1068 = vrcp.f32 %v750_v5  ;;  %v663_v12 = vadd.f32 %v1428_v45, %v662_v11 }
 0x1e7   :  { %v1059_v13 = vpop.eup %1058  ;;  %1070 = vrcp.f32 %v749_v8  ;;  %v857_v14 = vmul.f32 -1.442695, %v668_v10 }
 0x1e8   :  { %v1061_v15 = vpop.eup %1060  ;;  %v752_v17 = vadd.f32 1.0, %v1059_v13  ;;  %1072 = vpow2.f32 %v854_v6  ;;  %v856_v18 = vmul.f32 -1.442695, %v663_v12  ;;  %v993_v19 = vpop.f32.mrb[10].mxu1 }
 0x1e9   :  { %v751_v20 = vadd.f32 1.0, %v1061_v15  ;;  %1074 = vpow2.f32 %v857_v14  ;;  %v678_v21 = vadd.f32 %v993_v19, %v1428_v45  ;;  %v672_v22 = vpop.f32.mrb[11].mxu1 }
 0x1ea   :  { %1076 = vrcp.f32 %v752_v17  ;;  %v673_v23 = vadd.f32 %v1428_v45, %v672_v22 }
 0x1eb   :  { %v1063_v24 = vpop.eup %1062  ;;  %1078 = vrcp.f32 %v751_v20  ;;  %v859_v25 = vmul.f32 -1.442695, %v678_v21 }
 0x1ec   :  { %v1065_v26 = vpop.eup %1064  ;;  %v754_v27 = vadd.f32 1.0, %v1063_v24  ;;  %1080 = vpow2.f32 %v856_v18  ;;  %v858_v28 = vmul.f32 -1.442695, %v673_v23  ;;  %v996_v29 = vpop.f32.mrb[12].mxu1 }
 0x1ed   :  { %v753_v30 = vadd.f32 1.0, %v1065_v26  ;;  %1082 = vpow2.f32 %v859_v25  ;;  %v688_v31 = vadd.f32 %v996_v29, %v1428_v45  ;;  %v682_v32 = vpop.f32.mrb[13].mxu1 }
 0x1ee   :  { %1084 = vrcp.f32 %v754_v27  ;;  %v683_v33 = vadd.f32 %v1428_v45, %v682_v32 }
 0x1ef   :  { %v1067_v34 = vpop.eup %1066  ;;  %1086 = vrcp.f32 %v753_v30  ;;  %v861_v35 = vmul.f32 -1.442695, %v688_v31 }
 0x1f0   :  { %v1069_v36 = vpop.eup %1068  ;;  %v756_v37 = vadd.f32 1.0, %v1067_v34  ;;  %1088 = vpow2.f32 %v858_v28  ;;  %v860_v38 = vmul.f32 -1.442695, %v683_v33  ;;  %v999_v39 = vpop.f32.mrb[14].mxu1 }
 0x1f1   :  { %v1071_v40 = vpop.eup %1070  ;;  %798 = vst [vmem:[#allocation3 + $0x8] sm:$0xff] %v1069_v36  ;;  %1090 = vpow2.f32 %v861_v35  ;;  %v698_v41 = vadd.f32 %v999_v39, %v1428_v45  ;;  %v692_v42 = vpop.f32.mrb[15].mxu1 }
 0x1f2   :  { %v1073_v43 = vpop.eup %1072  ;;  %797 = vst [vmem:[#allocation3] sm:$0xff] %v1071_v40  ;;  %1092 = vrcp.f32 %v756_v37  ;;  %v693_v44 = vadd.f32 %v1428_v45, %v692_v42 }
 0x1f3   :  { %v1075_v46 = vpop.eup %1074  ;;  %v755_v47 = vadd.f32 1.0, %v1073_v43  ;;  %1094 = vpow2.f32 %v860_v38  ;;  %v863_v48 = vmul.f32 -1.442695, %v698_v41 }
 0x1f4   :  { %v1077_v9 = vpop.eup %1076  ;;  %v758_v49 = vadd.f32 1.0, %v1075_v46  ;;  %v862_v50 = vmul.f32 -1.442695, %v693_v44 }
 0x1f5   :  { %v1079_v51 = vpop.eup %1078  ;;  %800 = vst [vmem:[#allocation3 + $0x18] sm:$0xff] %v1077_v9  ;;  %1096 = vrcp.f32 %v755_v47 }
 0x1f6   :  { %v1081_v52 = vpop.eup %1080  ;;  %799 = vst [vmem:[#allocation3 + $0x10] sm:$0xff] %v1079_v51  ;;  %1098 = vrcp.f32 %v758_v49 }
 0x1f7   :  { %v1083_v53 = vpop.eup %1082  ;;  %v757_v16 = vadd.f32 1.0, %v1081_v52  ;;  %1100 = vpow2.f32 %v863_v48 }
 0x1f8   :  { %v1085_v54 = vpop.eup %1084  ;;  %v760_v55 = vadd.f32 1.0, %v1083_v53  ;;  %1102 = vpow2.f32 %v862_v50 }
 0x1f9   :  { %v1087_v45 = vpop.eup %1086  ;;  %802 = vst [vmem:[#allocation3 + $0x28] sm:$0xff] %v1085_v54  ;;  %1104 = vrcp.f32 %v757_v16 }
 0x1fa   :  { %v1089_v56 = vpop.eup %1088  ;;  %801 = vst [vmem:[#allocation3 + $0x20] sm:$0xff] %v1087_v45  ;;  %1106 = vrcp.f32 %v760_v55 }
 0x1fb   :  { %v1091_v57 = vpop.eup %1090  ;;  %v759_v58 = vadd.f32 1.0, %v1089_v56 }
 0x1fc   :  { %v1093_v59 = vpop.eup %1092  ;;  %v762_v60 = vadd.f32 1.0, %v1091_v57 }
 0x1fd   :  { %v1095_v61 = vpop.eup %1094  ;;  %804 = vst [vmem:[#allocation3 + $0x38] sm:$0xff] %v1093_v59  ;;  %1108 = vrcp.f32 %v759_v58 }
 0x1fe   :  { %1110 = vrcp.f32 %v762_v60  ;;  %v761_v62 = vadd.f32 1.0, %v1095_v61 }
 0x1ff   :  { %v1097_v63 = vpop.eup %1096 }
 0x200   :  { %v1099_v0 = vpop.eup %1098  ;;  %803 = vst [vmem:[#allocation3 + $0x30] sm:$0xff] %v1097_v63  ;;  %1112 = vrcp.f32 %v761_v62 }
 0x201   :  { %v1101_v1 = vpop.eup %1100  ;;  %806 = vst [vmem:[#allocation3 + $0x48] sm:$0xff] %v1099_v0 }
 0x202   :  { %v1103_v2 = vpop.eup %1102  ;;  %v764_v3 = vadd.f32 1.0, %v1101_v1 }
 0x203   :  { %v1105_v4 = vpop.eup %1104  ;;  %v763_v5 = vadd.f32 1.0, %v1103_v2 }
 0x204   :  { %v1107_v6 = vpop.eup %1106  ;;  %805 = vst [vmem:[#allocation3 + $0x40] sm:$0xff] %v1105_v4  ;;  %1114 = vrcp.f32 %v764_v3 }
 0x205   :  { %808 = vst [vmem:[#allocation3 + $0x58] sm:$0xff] %v1107_v6  ;;  %1116 = vrcp.f32 %v763_v5 }
 0x207   :  { %v1109_v7 = vpop.eup %1108 }
 0x208   :  { %v1111_v8 = vpop.eup %1110  ;;  %807 = vst [vmem:[#allocation3 + $0x50] sm:$0xff] %v1109_v7 }
 0x209   :  { %810 = vst [vmem:[#allocation3 + $0x68] sm:$0xff] %v1111_v8 }
 0x20a   :  { %v1113_v10 = vpop.eup %1112 }
 0x20b   :  { %809 = vst [vmem:[#allocation3 + $0x60] sm:$0xff] %v1113_v10 }
 0x20e   :  { %v1115_v11 = vpop.eup %1114 }
 0x20f   :  { %v1117_v12 = vpop.eup %1116  ;;  %812 = vst [vmem:[#allocation3 + $0x78] sm:$0xff] %v1115_v11 }
 0x210   :  { %811 = vst [vmem:[#allocation3 + $0x70] sm:$0xff] %v1117_v12 }
 0x211   :  { %1129 = shalt.err (!%p1126_p4)
}
 0x212   :  { %s1130_s19 = scalar_lea.hbm %s1466_s8, 2048 }
 0x213   :  { %p1131_p5 = scmp.ne.s32.totalorder %s1466_s8, %s1130_s19  ;;  %p1134_p6 = scmp.lt.u32.totalorder %s1130_s19, %s1466_s8 }
 0x215   :  { %p1136_p7 = pnand %p1134_p6, %p1131_p5 }
 0x217   :  { %1139 = shalt.err (!%p1136_p7)
}
 0x218   :  { %s1144_s21 = smov 128   ;;  %s1145_s22 = smov 8  }
 0x219   :  { %824 = dma.vmem_to_hbm [thread:$0]  %s819_s16, 2048, %s1466_s8, [#allocation4], %s1144_s21, %s1144_s21, %s1145_s22  }
 0x21a   :  { %1140 = dma.done.wait [#allocation4], 2048  }
 0x21b   :  { %1141 = vsyncadd [#allocation4], 4294965248 }
 0x21c   :  { %828 = vsyncpa [#allocation4], 1 }

</bundles_post_ra>
